<compile_context>
chip_gen: v6e
topology: v6e:2x2x1
jax: 0.10.0
libtpu: 0.0.40
codegen_flags: <defaults>
</compile_context>

<pallas_src>
import jax
import jax.numpy as jnp
import numpy as np
from jax import lax
from jax.experimental import pallas as pl
from jax.experimental.pallas import tpu as pltpu


def _dsb_kernel(patch_ref, w1_ref, t1_ref, w2_ref, t2_ref, w3_ref, alpha_ref,
                out_ref, pad_ref):
    BB, Hp, Wp, Cint = pad_ref.shape
    Ho, Wo = Hp - 2, Wp - 2
    P = Ho * Wo
    Cin = patch_ref.shape[1] // 4
    Cout = out_ref.shape[1]

    # ---- extension branch ---------------------------------------------------
    # conv1: 2x2 / stride-2 as one im2col matmul; BN scale pre-folded into w1.
    patches = patch_ref[...]                                    # (BB*P, 4*Cin)
    h1 = jnp.dot(patches, w1_ref[...], preferred_element_type=jnp.float32)
    h1 = h1 + t1_ref[...]
    a1 = alpha_ref[0]
    h1 = jnp.where(h1 > 0, h1, a1 * h1)

    # zero-padded image (padding=1) in VMEM scratch: one zero fill + one bulk
    # interior store (no per-row writes).
    pad_ref[...] = jnp.zeros(pad_ref.shape, jnp.float32)
    pad_ref[:, 1:Ho + 1, 1:Wo + 1, :] = h1.reshape(BB, Ho, Wo, Cint)

    # conv2: 3x3 / pad 1 as 9 full-image matmuls (M = BB*P); BN scale folded.
    h2 = None
    for dh in range(3):
        for dw in range(3):
            win = pad_ref[:, dh:dh + Ho, dw:dw + Wo, :].reshape(BB * P, Cint)
            contrib = jnp.dot(win, w2_ref[dh, dw],
                              preferred_element_type=jnp.float32)
            h2 = contrib if h2 is None else h2 + contrib
    h2 = h2 + t2_ref[...]
    a2 = alpha_ref[1]
    h2 = jnp.where(h2 > 0, h2, a2 * h2)

    # conv3: 1x1 matmul.  Dropout2d is identity at inference time.
    ext = jnp.dot(h2, w3_ref[...], preferred_element_type=jnp.float32)

    # ---- main branch: 2x2 max pool from the im2col patch chunks --------------
    m = jnp.maximum(
        jnp.maximum(patches[:, 0:Cin], patches[:, Cin:2 * Cin]),
        jnp.maximum(patches[:, 2 * Cin:3 * Cin], patches[:, 3 * Cin:4 * Cin]))

    # ---- merge (zero channel padding) + final PReLU, single full store -------
    if Cout > Cin:
        m = jnp.concatenate(
            [m, jnp.zeros((BB * P, Cout - Cin), jnp.float32)], axis=-1)
    y = ext + m
    a_out = alpha_ref[2]
    out_ref[...] = jnp.where(y > 0, y, a_out * y).astype(out_ref.dtype)


def downsampling_bottleneck(x, p, *, batch_block=None):
    """x: (B, Cin, H, W) NCHW float32.  Returns (out NCHW, indices=[])."""
    B, Cin, H, W = x.shape
    Cout = p["w3"].shape[0]
    Cint = p["w1"].shape[0]
    assert Cout >= Cin, "ENet downsampling requires out_channels >= in_channels"
    Ho, Wo = H // 2, W // 2
    P = Ho * Wo
    BB = B if batch_block is None else batch_block
    assert B % BB == 0
    eps = 1e-5

    # im2col patches built straight from NCHW with a single transpose:
    # (B*P, 2*2*Cin), tap order (kh, kw, ci).  The four Cin-wide chunks are
    # exactly the 2x2 pooling-window taps, so no separate pooled input.
    patches = (x.reshape(B, Cin, Ho, 2, Wo, 2)
                .transpose(0, 2, 4, 3, 5, 1)
                .reshape(B * P, 4 * Cin))

    # fold BatchNorm (eval mode) into the conv weights + a shift vector
    s1 = p["g1"] / jnp.sqrt(p["v1"] + eps)
    t1 = (p["b1"] - p["m1"] * s1).reshape(1, Cint)
    s2 = p["g2"] / jnp.sqrt(p["v2"] + eps)
    t2 = (p["b2"] - p["m2"] * s2).reshape(1, Cint)

    # weight re-layouts (PyTorch OIHW -> matmul form), BN scale folded in
    w1m = jnp.transpose(p["w1"], (2, 3, 1, 0)).reshape(4 * Cin, Cint) * s1[None, :]
    w2k = jnp.transpose(p["w2"], (2, 3, 1, 0)) * s2[None, None, None, :]  # (3,3,Ci,Co)
    w3m = jnp.transpose(p["w3"][:, :, 0, 0], (1, 0))                       # (Cint, Cout)

    alphas = jnp.concatenate([p["a1"].reshape(1), p["a2"].reshape(1),
                              p["aout"].reshape(1)]).astype(jnp.float32)

    smem = pl.BlockSpec(memory_space=pltpu.MemorySpace.SMEM)

    out = pl.pallas_call(
        _dsb_kernel,
        out_shape=jax.ShapeDtypeStruct((B * P, Cout), jnp.float32),
        grid=(B // BB,),
        in_specs=[
            pl.BlockSpec((BB * P, 4 * Cin), lambda i: (i, 0)),
            pl.BlockSpec((4 * Cin, Cint), lambda i: (0, 0)),
            pl.BlockSpec((1, Cint), lambda i: (0, 0)),
            pl.BlockSpec((3, 3, Cint, Cint), lambda i: (0, 0, 0, 0)),
            pl.BlockSpec((1, Cint), lambda i: (0, 0)),
            pl.BlockSpec((Cint, Cout), lambda i: (0, 0)),
            smem,
        ],
        out_specs=pl.BlockSpec((BB * P, Cout), lambda i: (i, 0)),
        scratch_shapes=[pltpu.VMEM((BB, Ho + 2, Wo + 2, Cint), jnp.float32)],
        compiler_params=pltpu.CompilerParams(
            dimension_semantics=("parallel",)),
    )(patches, w1m, t1, w2k, t2, w3m, alphas)

    out = out.reshape(B, Ho, Wo, Cout).transpose(0, 3, 1, 2)   # back to NCHW
    # TODO(synk): return_indices=True (max-pool argmax) not implemented; the
    # module default (return_indices=False) returns an empty list.
    return out, []


def ref_forward(x, p):
    """Pure-JAX reference (mirrors the PyTorch forward in eval mode)."""
    eps = 1e-5

    def bn_prelu(h, g, b_, m_, v_, a):
        h = (h - m_[None, :, None, None]) / jnp.sqrt(v_[None, :, None, None] + eps)
        h = h * g[None, :, None, None] + b_[None, :, None, None]
        return jnp.where(h > 0, h, a * h)

    dn = ("NCHW", "OIHW", "NCHW")
    h = lax.conv_general_dilated(x, p["w1"], (2, 2), "VALID", dimension_numbers=dn)
    h = bn_prelu(h, p["g1"], p["b1"], p["m1"], p["v1"], p["a1"])
    h = lax.conv_general_dilated(h, p["w2"], (1, 1), [(1, 1), (1, 1)],
                                 dimension_numbers=dn)
    h = bn_prelu(h, p["g2"], p["b2"], p["m2"], p["v2"], p["a2"])
    ext = lax.conv_general_dilated(h, p["w3"], (1, 1), "VALID",
                                   dimension_numbers=dn)
    B, Cin, H, W = x.shape
    main = lax.reduce_window(x, -jnp.inf, lax.max, (1, 1, 2, 2), (1, 1, 2, 2),
                             "VALID")
    Cout = ext.shape[1]
    zeros = jnp.zeros((B, Cout - Cin, H // 2, W // 2), x.dtype)
    main = jnp.concatenate([main, zeros], axis=1)
    y = main + ext
    return jnp.where(y > 0, y, p["aout"] * y)


if __name__ == "__main__":
    B, Cin, Cout, H, W = 2, 4, 8, 16, 16
    Cint = (Cin + Cout) // 2  # internal_channels = (in + out) // 2 = 6

    key = jax.random.PRNGKey(0)
    ks = jax.random.split(key, 12)
    p = {
        "w1": 0.2 * jax.random.normal(ks[0], (Cint, Cin, 2, 2), jnp.float32),
        "g1": 1.0 + 0.1 * jax.random.normal(ks[1], (Cint,), jnp.float32),
        "b1": 0.1 * jax.random.normal(ks[2], (Cint,), jnp.float32),
        "m1": 0.1 * jax.random.normal(ks[3], (Cint,), jnp.float32),
        "v1": 1.0 + 0.1 * jax.random.uniform(ks[4], (Cint,), jnp.float32),
        "a1": jnp.array([0.25], jnp.float32),   # nn.PReLU() default
        "w2": 0.2 * jax.random.normal(ks[5], (Cint, Cint, 3, 3), jnp.float32),
        "g2": 1.0 + 0.1 * jax.random.normal(ks[6], (Cint,), jnp.float32),
        "b2": 0.1 * jax.random.normal(ks[7], (Cint,), jnp.float32),
        "m2": 0.1 * jax.random.normal(ks[8], (Cint,), jnp.float32),
        "v2": 1.0 + 0.1 * jax.random.uniform(ks[9], (Cint,), jnp.float32),
        "a2": jnp.array([0.25], jnp.float32),
        "w3": 0.2 * jax.random.normal(ks[10], (Cout, Cint, 1, 1), jnp.float32),
        "aout": jnp.array([0.25], jnp.float32),
    }
    x = jax.random.normal(ks[11], (B, Cin, H, W), jnp.float32)

    out, indices = downsampling_bottleneck(x, p)
    out = jax.block_until_ready(out)

    assert out.shape == (B, Cout, H // 2, W // 2)
    ref = ref_forward(x, p)
    np.testing.assert_allclose(np.asarray(out), np.asarray(ref),
                               atol=1e-4, rtol=1e-4)
    print("KERNEL_OK")
</pallas_src>

<mosaic_0001>
module attributes {stable_mosaic.version = 11 : i64} {
  func.func @_dsb_kernel(%arg0: i32, %arg1: memref<128x16xf32, #tpu.memory_space<vmem>>, %arg2: memref<16x6xf32, #tpu.memory_space<vmem>>, %arg3: memref<1x6xf32, #tpu.memory_space<vmem>>, %arg4: memref<3x3x6x6xf32, #tpu.memory_space<vmem>>, %arg5: memref<1x6xf32, #tpu.memory_space<vmem>>, %arg6: memref<6x8xf32, #tpu.memory_space<vmem>>, %arg7: memref<3xf32, #tpu.memory_space<smem>>, %arg8: memref<128x8xf32, #tpu.memory_space<vmem>>, %arg9: memref<2x10x10x6xf32, #tpu.memory_space<vmem>>) attributes {dimension_semantics = [#tpu.dimension_semantics<parallel>], iteration_bounds = array<i64: 1>, scalar_prefetch = 0 : i64, scratch_operands = 1 : i64, tpu.core_type = #tpu.core_type<tc>, window_params = [{transform_indices = @transform_0, window_bounds = array<i64: 128, 16>}, {pipeline_mode = #tpu.pipeline_mode<synchronous>, transform_indices = @transform_1, window_bounds = array<i64: 16, 6>}, {pipeline_mode = #tpu.pipeline_mode<synchronous>, transform_indices = @transform_2, window_bounds = array<i64: 1, 6>}, {pipeline_mode = #tpu.pipeline_mode<synchronous>, transform_indices = @transform_3, window_bounds = array<i64: 3, 3, 6, 6>}, {pipeline_mode = #tpu.pipeline_mode<synchronous>, transform_indices = @transform_4, window_bounds = array<i64: 1, 6>}, {pipeline_mode = #tpu.pipeline_mode<synchronous>, transform_indices = @transform_5, window_bounds = array<i64: 6, 8>}, {transform_indices = @transform_6, window_bounds = array<i64: 3>}, {transform_indices = @transform_7, window_bounds = array<i64: 128, 8>}]} {
    %c0 = arith.constant 0 : index
    %c0_0 = arith.constant 0 : index
    %0 = vector.load %arg1[%c0, %c0_0] : memref<128x16xf32, #tpu.memory_space<vmem>>, vector<128x16xf32>
    %c0_1 = arith.constant 0 : index
    %c0_2 = arith.constant 0 : index
    %1 = vector.load %arg2[%c0_1, %c0_2] : memref<16x6xf32, #tpu.memory_space<vmem>>, vector<16x6xf32>
    %cst = arith.constant dense<0.000000e+00> : vector<128x6xf32>
    %2 = tpu.matmul %0, %1, %cst {dimension_numbers = #tpu.dot_dimension_numbers<[1], [0], [0], [1], [0, 0, 1, 1], [], []>} : vector<128x16xf32>, vector<16x6xf32>, vector<128x6xf32> -> vector<128x6xf32>
    %c0_3 = arith.constant 0 : index
    %c0_4 = arith.constant 0 : index
    %3 = vector.load %arg3[%c0_3, %c0_4] : memref<1x6xf32, #tpu.memory_space<vmem>>, vector<1x6xf32>
    %4 = vector.broadcast %3 : vector<1x6xf32> to vector<128x6xf32>
    %5 = arith.addf %2, %4 : vector<128x6xf32>
    %c0_5 = arith.constant 0 : index
    %6 = memref.load %arg7[%c0_5] : memref<3xf32, #tpu.memory_space<smem>>
    %cst_6 = arith.constant 0.000000e+00 : f32
    %7 = vector.broadcast %cst_6 : f32 to vector<128x6xf32>
    %8 = arith.cmpf ogt, %5, %7 : vector<128x6xf32>
    %9 = vector.broadcast %6 : f32 to vector<128x6xf32>
    %10 = arith.mulf %9, %5 : vector<128x6xf32>
    %11 = arith.select %8, %5, %10 : vector<128x6xi1>, vector<128x6xf32>
    %cst_7 = arith.constant 0.000000e+00 : f32
    %12 = vector.broadcast %cst_7 : f32 to vector<2x10x10x6xf32>
    %c0_8 = arith.constant 0 : index
    %c0_9 = arith.constant 0 : index
    %c0_10 = arith.constant 0 : index
    %c0_11 = arith.constant 0 : index
    %13 = vector.load %arg9[%c0_8, %c0_9, %c0_10, %c0_11] : memref<2x10x10x6xf32, #tpu.memory_space<vmem>>, vector<2x10x10x6xf32>
    tpu.vector_store %arg9[%c0_8, %c0_9, %c0_10, %c0_11], %12 {strides = array<i32>} : memref<2x10x10x6xf32, #tpu.memory_space<vmem>>, vector<2x10x10x6xf32>,
    %14 = vector.shape_cast %11 : vector<128x6xf32> to vector<2x8x8x6xf32>
    %c0_12 = arith.constant 0 : index
    %c1 = arith.constant 1 : index
    %c1_13 = arith.constant 1 : index
    %c0_14 = arith.constant 0 : index
    %15 = vector.load %arg9[%c0_12, %c1, %c1_13, %c0_14] : memref<2x10x10x6xf32, #tpu.memory_space<vmem>>, vector<2x8x8x6xf32>
    tpu.vector_store %arg9[%c0_12, %c1, %c1_13, %c0_14], %14 {strides = array<i32>} : memref<2x10x10x6xf32, #tpu.memory_space<vmem>>, vector<2x8x8x6xf32>,
    %c0_15 = arith.constant 0 : index
    %c0_16 = arith.constant 0 : index
    %c0_17 = arith.constant 0 : index
    %c0_18 = arith.constant 0 : index
    %16 = vector.load %arg9[%c0_15, %c0_16, %c0_17, %c0_18] : memref<2x10x10x6xf32, #tpu.memory_space<vmem>>, vector<2x8x8x6xf32>
    %17 = vector.shape_cast %16 : vector<2x8x8x6xf32> to vector<128x6xf32>
    %c0_19 = arith.constant 0 : index
    %c0_20 = arith.constant 0 : index
    %c0_21 = arith.constant 0 : index
    %c0_22 = arith.constant 0 : index
    %18 = vector.load %arg4[%c0_19, %c0_20, %c0_21, %c0_22] : memref<3x3x6x6xf32, #tpu.memory_space<vmem>>, vector<1x1x6x6xf32>
    %19 = vector.shape_cast %18 : vector<1x1x6x6xf32> to vector<6x6xf32>
    %cst_23 = arith.constant dense<0.000000e+00> : vector<128x6xf32>
    %20 = tpu.matmul %17, %19, %cst_23 {dimension_numbers = #tpu.dot_dimension_numbers<[1], [0], [0], [1], [0, 0, 1, 1], [], []>} : vector<128x6xf32>, vector<6x6xf32>, vector<128x6xf32> -> vector<128x6xf32>
    %c0_24 = arith.constant 0 : index
    %c0_25 = arith.constant 0 : index
    %c1_26 = arith.constant 1 : index
    %c0_27 = arith.constant 0 : index
    %21 = vector.load %arg9[%c0_24, %c0_25, %c1_26, %c0_27] : memref<2x10x10x6xf32, #tpu.memory_space<vmem>>, vector<2x8x8x6xf32>
    %22 = vector.shape_cast %21 : vector<2x8x8x6xf32> to vector<128x6xf32>
    %c0_28 = arith.constant 0 : index
    %c1_29 = arith.constant 1 : index
    %c0_30 = arith.constant 0 : index
    %c0_31 = arith.constant 0 : index
    %23 = vector.load %arg4[%c0_28, %c1_29, %c0_30, %c0_31] : memref<3x3x6x6xf32, #tpu.memory_space<vmem>>, vector<1x1x6x6xf32>
    %24 = vector.shape_cast %23 : vector<1x1x6x6xf32> to vector<6x6xf32>
    %cst_32 = arith.constant dense<0.000000e+00> : vector<128x6xf32>
    %25 = tpu.matmul %22, %24, %cst_32 {dimension_numbers = #tpu.dot_dimension_numbers<[1], [0], [0], [1], [0, 0, 1, 1], [], []>} : vector<128x6xf32>, vector<6x6xf32>, vector<128x6xf32> -> vector<128x6xf32>
    %26 = arith.addf %20, %25 : vector<128x6xf32>
    %c0_33 = arith.constant 0 : index
    %c0_34 = arith.constant 0 : index
    %c2 = arith.constant 2 : index
    %c0_35 = arith.constant 0 : index
    %27 = vector.load %arg9[%c0_33, %c0_34, %c2, %c0_35] : memref<2x10x10x6xf32, #tpu.memory_space<vmem>>, vector<2x8x8x6xf32>
    %28 = vector.shape_cast %27 : vector<2x8x8x6xf32> to vector<128x6xf32>
    %c0_36 = arith.constant 0 : index
    %c2_37 = arith.constant 2 : index
    %c0_38 = arith.constant 0 : index
    %c0_39 = arith.constant 0 : index
    %29 = vector.load %arg4[%c0_36, %c2_37, %c0_38, %c0_39] : memref<3x3x6x6xf32, #tpu.memory_space<vmem>>, vector<1x1x6x6xf32>
    %30 = vector.shape_cast %29 : vector<1x1x6x6xf32> to vector<6x6xf32>
    %cst_40 = arith.constant dense<0.000000e+00> : vector<128x6xf32>
    %31 = tpu.matmul %28, %30, %cst_40 {dimension_numbers = #tpu.dot_dimension_numbers<[1], [0], [0], [1], [0, 0, 1, 1], [], []>} : vector<128x6xf32>, vector<6x6xf32>, vector<128x6xf32> -> vector<128x6xf32>
    %32 = arith.addf %26, %31 : vector<128x6xf32>
    %c0_41 = arith.constant 0 : index
    %c1_42 = arith.constant 1 : index
    %c0_43 = arith.constant 0 : index
    %c0_44 = arith.constant 0 : index
    %33 = vector.load %arg9[%c0_41, %c1_42, %c0_43, %c0_44] : memref<2x10x10x6xf32, #tpu.memory_space<vmem>>, vector<2x8x8x6xf32>
    %34 = vector.shape_cast %33 : vector<2x8x8x6xf32> to vector<128x6xf32>
    %c1_45 = arith.constant 1 : index
    %c0_46 = arith.constant 0 : index
    %c0_47 = arith.constant 0 : index
    %c0_48 = arith.constant 0 : index
    %35 = vector.load %arg4[%c1_45, %c0_46, %c0_47, %c0_48] : memref<3x3x6x6xf32, #tpu.memory_space<vmem>>, vector<1x1x6x6xf32>
    %36 = vector.shape_cast %35 : vector<1x1x6x6xf32> to vector<6x6xf32>
    %cst_49 = arith.constant dense<0.000000e+00> : vector<128x6xf32>
    %37 = tpu.matmul %34, %36, %cst_49 {dimension_numbers = #tpu.dot_dimension_numbers<[1], [0], [0], [1], [0, 0, 1, 1], [], []>} : vector<128x6xf32>, vector<6x6xf32>, vector<128x6xf32> -> vector<128x6xf32>
    %38 = arith.addf %32, %37 : vector<128x6xf32>
    %c0_50 = arith.constant 0 : index
    %c1_51 = arith.constant 1 : index
    %c1_52 = arith.constant 1 : index
    %c0_53 = arith.constant 0 : index
    %39 = vector.load %arg9[%c0_50, %c1_51, %c1_52, %c0_53] : memref<2x10x10x6xf32, #tpu.memory_space<vmem>>, vector<2x8x8x6xf32>
    %40 = vector.shape_cast %39 : vector<2x8x8x6xf32> to vector<128x6xf32>
    %c1_54 = arith.constant 1 : index
    %c1_55 = arith.constant 1 : index
    %c0_56 = arith.constant 0 : index
    %c0_57 = arith.constant 0 : index
    %41 = vector.load %arg4[%c1_54, %c1_55, %c0_56, %c0_57] : memref<3x3x6x6xf32, #tpu.memory_space<vmem>>, vector<1x1x6x6xf32>
    %42 = vector.shape_cast %41 : vector<1x1x6x6xf32> to vector<6x6xf32>
    %cst_58 = arith.constant dense<0.000000e+00> : vector<128x6xf32>
    %43 = tpu.matmul %40, %42, %cst_58 {dimension_numbers = #tpu.dot_dimension_numbers<[1], [0], [0], [1], [0, 0, 1, 1], [], []>} : vector<128x6xf32>, vector<6x6xf32>, vector<128x6xf32> -> vector<128x6xf32>
    %44 = arith.addf %38, %43 : vector<128x6xf32>
    %c0_59 = arith.constant 0 : index
    %c1_60 = arith.constant 1 : index
    %c2_61 = arith.constant 2 : index
    %c0_62 = arith.constant 0 : index
    %45 = vector.load %arg9[%c0_59, %c1_60, %c2_61, %c0_62] : memref<2x10x10x6xf32, #tpu.memory_space<vmem>>, vector<2x8x8x6xf32>
    %46 = vector.shape_cast %45 : vector<2x8x8x6xf32> to vector<128x6xf32>
    %c1_63 = arith.constant 1 : index
    %c2_64 = arith.constant 2 : index
    %c0_65 = arith.constant 0 : index
    %c0_66 = arith.constant 0 : index
    %47 = vector.load %arg4[%c1_63, %c2_64, %c0_65, %c0_66] : memref<3x3x6x6xf32, #tpu.memory_space<vmem>>, vector<1x1x6x6xf32>
    %48 = vector.shape_cast %47 : vector<1x1x6x6xf32> to vector<6x6xf32>
    %cst_67 = arith.constant dense<0.000000e+00> : vector<128x6xf32>
    %49 = tpu.matmul %46, %48, %cst_67 {dimension_numbers = #tpu.dot_dimension_numbers<[1], [0], [0], [1], [0, 0, 1, 1], [], []>} : vector<128x6xf32>, vector<6x6xf32>, vector<128x6xf32> -> vector<128x6xf32>
    %50 = arith.addf %44, %49 : vector<128x6xf32>
    %c0_68 = arith.constant 0 : index
    %c2_69 = arith.constant 2 : index
    %c0_70 = arith.constant 0 : index
    %c0_71 = arith.constant 0 : index
    %51 = vector.load %arg9[%c0_68, %c2_69, %c0_70, %c0_71] : memref<2x10x10x6xf32, #tpu.memory_space<vmem>>, vector<2x8x8x6xf32>
    %52 = vector.shape_cast %51 : vector<2x8x8x6xf32> to vector<128x6xf32>
    %c2_72 = arith.constant 2 : index
    %c0_73 = arith.constant 0 : index
    %c0_74 = arith.constant 0 : index
    %c0_75 = arith.constant 0 : index
    %53 = vector.load %arg4[%c2_72, %c0_73, %c0_74, %c0_75] : memref<3x3x6x6xf32, #tpu.memory_space<vmem>>, vector<1x1x6x6xf32>
    %54 = vector.shape_cast %53 : vector<1x1x6x6xf32> to vector<6x6xf32>
    %cst_76 = arith.constant dense<0.000000e+00> : vector<128x6xf32>
    %55 = tpu.matmul %52, %54, %cst_76 {dimension_numbers = #tpu.dot_dimension_numbers<[1], [0], [0], [1], [0, 0, 1, 1], [], []>} : vector<128x6xf32>, vector<6x6xf32>, vector<128x6xf32> -> vector<128x6xf32>
    %56 = arith.addf %50, %55 : vector<128x6xf32>
    %c0_77 = arith.constant 0 : index
    %c2_78 = arith.constant 2 : index
    %c1_79 = arith.constant 1 : index
    %c0_80 = arith.constant 0 : index
    %57 = vector.load %arg9[%c0_77, %c2_78, %c1_79, %c0_80] : memref<2x10x10x6xf32, #tpu.memory_space<vmem>>, vector<2x8x8x6xf32>
    %58 = vector.shape_cast %57 : vector<2x8x8x6xf32> to vector<128x6xf32>
    %c2_81 = arith.constant 2 : index
    %c1_82 = arith.constant 1 : index
    %c0_83 = arith.constant 0 : index
    %c0_84 = arith.constant 0 : index
    %59 = vector.load %arg4[%c2_81, %c1_82, %c0_83, %c0_84] : memref<3x3x6x6xf32, #tpu.memory_space<vmem>>, vector<1x1x6x6xf32>
    %60 = vector.shape_cast %59 : vector<1x1x6x6xf32> to vector<6x6xf32>
    %cst_85 = arith.constant dense<0.000000e+00> : vector<128x6xf32>
    %61 = tpu.matmul %58, %60, %cst_85 {dimension_numbers = #tpu.dot_dimension_numbers<[1], [0], [0], [1], [0, 0, 1, 1], [], []>} : vector<128x6xf32>, vector<6x6xf32>, vector<128x6xf32> -> vector<128x6xf32>
    %62 = arith.addf %56, %61 : vector<128x6xf32>
    %c0_86 = arith.constant 0 : index
    %c2_87 = arith.constant 2 : index
    %c2_88 = arith.constant 2 : index
    %c0_89 = arith.constant 0 : index
    %63 = vector.load %arg9[%c0_86, %c2_87, %c2_88, %c0_89] : memref<2x10x10x6xf32, #tpu.memory_space<vmem>>, vector<2x8x8x6xf32>
    %64 = vector.shape_cast %63 : vector<2x8x8x6xf32> to vector<128x6xf32>
    %c2_90 = arith.constant 2 : index
    %c2_91 = arith.constant 2 : index
    %c0_92 = arith.constant 0 : index
    %c0_93 = arith.constant 0 : index
    %65 = vector.load %arg4[%c2_90, %c2_91, %c0_92, %c0_93] : memref<3x3x6x6xf32, #tpu.memory_space<vmem>>, vector<1x1x6x6xf32>
    %66 = vector.shape_cast %65 : vector<1x1x6x6xf32> to vector<6x6xf32>
    %cst_94 = arith.constant dense<0.000000e+00> : vector<128x6xf32>
    %67 = tpu.matmul %64, %66, %cst_94 {dimension_numbers = #tpu.dot_dimension_numbers<[1], [0], [0], [1], [0, 0, 1, 1], [], []>} : vector<128x6xf32>, vector<6x6xf32>, vector<128x6xf32> -> vector<128x6xf32>
    %68 = arith.addf %62, %67 : vector<128x6xf32>
    %c0_95 = arith.constant 0 : index
    %c0_96 = arith.constant 0 : index
    %69 = vector.load %arg5[%c0_95, %c0_96] : memref<1x6xf32, #tpu.memory_space<vmem>>, vector<1x6xf32>
    %70 = vector.broadcast %69 : vector<1x6xf32> to vector<128x6xf32>
    %71 = arith.addf %68, %70 : vector<128x6xf32>
    %c1_97 = arith.constant 1 : index
    %72 = memref.load %arg7[%c1_97] : memref<3xf32, #tpu.memory_space<smem>>
    %cst_98 = arith.constant 0.000000e+00 : f32
    %73 = vector.broadcast %cst_98 : f32 to vector<128x6xf32>
    %74 = arith.cmpf ogt, %71, %73 : vector<128x6xf32>
    %75 = vector.broadcast %72 : f32 to vector<128x6xf32>
    %76 = arith.mulf %75, %71 : vector<128x6xf32>
    %77 = arith.select %74, %71, %76 : vector<128x6xi1>, vector<128x6xf32>
    %c0_99 = arith.constant 0 : index
    %c0_100 = arith.constant 0 : index
    %78 = vector.load %arg6[%c0_99, %c0_100] : memref<6x8xf32, #tpu.memory_space<vmem>>, vector<6x8xf32>
    %cst_101 = arith.constant dense<0.000000e+00> : vector<128x8xf32>
    %79 = tpu.matmul %77, %78, %cst_101 {dimension_numbers = #tpu.dot_dimension_numbers<[1], [0], [0], [1], [0, 0, 1, 1], [], []>} : vector<128x6xf32>, vector<6x8xf32>, vector<128x8xf32> -> vector<128x8xf32>
    %80 = vector.extract_strided_slice %0 {offsets = [0, 0], sizes = [128, 4], strides = [1, 1]} : vector<128x16xf32> to vector<128x4xf32>
    %81 = vector.extract_strided_slice %0 {offsets = [0, 4], sizes = [128, 4], strides = [1, 1]} : vector<128x16xf32> to vector<128x4xf32>
    %82 = arith.maximumf %80, %81 : vector<128x4xf32>
    %83 = vector.extract_strided_slice %0 {offsets = [0, 8], sizes = [128, 4], strides = [1, 1]} : vector<128x16xf32> to vector<128x4xf32>
    %84 = vector.extract_strided_slice %0 {offsets = [0, 12], sizes = [128, 4], strides = [1, 1]} : vector<128x16xf32> to vector<128x4xf32>
    %85 = arith.maximumf %83, %84 : vector<128x4xf32>
    %86 = arith.maximumf %82, %85 : vector<128x4xf32>
    %cst_102 = arith.constant 0.000000e+00 : f32
    %87 = vector.broadcast %cst_102 : f32 to vector<128x4xf32>
    %88 = tpu.concatenate %86, %87 in 1 : vector<128x4xf32>, vector<128x4xf32> -> vector<128x8xf32>
    %89 = arith.addf %79, %88 : vector<128x8xf32>
    %c2_103 = arith.constant 2 : index
    %90 = memref.load %arg7[%c2_103] : memref<3xf32, #tpu.memory_space<smem>>
    %cst_104 = arith.constant 0.000000e+00 : f32
    %91 = vector.broadcast %cst_104 : f32 to vector<128x8xf32>
    %92 = arith.cmpf ogt, %89, %91 : vector<128x8xf32>
    %93 = vector.broadcast %90 : f32 to vector<128x8xf32>
    %94 = arith.mulf %93, %89 : vector<128x8xf32>
    %95 = arith.select %92, %89, %94 : vector<128x8xi1>, vector<128x8xf32>
    %c0_105 = arith.constant 0 : index
    %c0_106 = arith.constant 0 : index
    %96 = vector.load %arg8[%c0_105, %c0_106] : memref<128x8xf32, #tpu.memory_space<vmem>>, vector<128x8xf32>
    tpu.vector_store %arg8[%c0_105, %c0_106], %95 {strides = array<i32>} : memref<128x8xf32, #tpu.memory_space<vmem>>, vector<128x8xf32>,
    return
  }
  func.func @transform_0(%arg0: i32) -> (i32, i32) {
    %c0_i32 = arith.constant 0 : i32
    %c0_i32_0 = arith.constant 0 : i32
    return %arg0, %c0_i32 : i32, i32
  }
  func.func @transform_1(%arg0: i32) -> (i32, i32) {
    %c0_i32 = arith.constant 0 : i32
    %c0_i32_0 = arith.constant 0 : i32
    %c0_i32_1 = arith.constant 0 : i32
    return %c0_i32, %c0_i32_0 : i32, i32
  }
  func.func @transform_2(%arg0: i32) -> (i32, i32) {
    %c0_i32 = arith.constant 0 : i32
    %c0_i32_0 = arith.constant 0 : i32
    %c0_i32_1 = arith.constant 0 : i32
    return %c0_i32, %c0_i32_0 : i32, i32
  }
  func.func @transform_3(%arg0: i32) -> (i32, i32, i32, i32) {
    %c0_i32 = arith.constant 0 : i32
    %c0_i32_0 = arith.constant 0 : i32
    %c0_i32_1 = arith.constant 0 : i32
    %c0_i32_2 = arith.constant 0 : i32
    %c0_i32_3 = arith.constant 0 : i32
    return %c0_i32, %c0_i32_0, %c0_i32_1, %c0_i32_2 : i32, i32, i32, i32
  }
  func.func @transform_4(%arg0: i32) -> (i32, i32) {
    %c0_i32 = arith.constant 0 : i32
    %c0_i32_0 = arith.constant 0 : i32
    %c0_i32_1 = arith.constant 0 : i32
    return %c0_i32, %c0_i32_0 : i32, i32
  }
  func.func @transform_5(%arg0: i32) -> (i32, i32) {
    %c0_i32 = arith.constant 0 : i32
    %c0_i32_0 = arith.constant 0 : i32
    %c0_i32_1 = arith.constant 0 : i32
    return %c0_i32, %c0_i32_0 : i32, i32
  }
  func.func @transform_6(%arg0: i32) -> i32 {
    %c0_i32 = arith.constant 0 : i32
    %c0_i32_0 = arith.constant 0 : i32
    return %c0_i32 : i32
  }
  func.func @transform_7(%arg0: i32) -> (i32, i32) {
    %c0_i32 = arith.constant 0 : i32
    %c0_i32_0 = arith.constant 0 : i32
    return %arg0, %c0_i32 : i32, i32
  }
}

</mosaic_0001>

<bundles_post_ra>
// kernel: tpu_custom_call.1
= control target key start
LH: loop header
LB: loop body
LE: loop exit
PB: predicated region body
PF: predicated region fallthrough
CT: control target
= control target key end

     0   :  { %12 = vsyncpa [#allocation4], 0  ;;  %s4767_s0 = inlined_call_operand.vmem [shape: f32[128,16], index: 0, kind: input, shape index: {}]   ;;  %s4768_s1 = inlined_call_operand.vmem [shape: f32[16,6], index: 1, kind: input, shape index: {}]   ;;  %s4769_s2 = inlined_call_operand.vmem [shape: f32[1,6], index: 2, kind: input, shape index: {}]   ;;  %s4770_s3 = inlined_call_operand.vmem [shape: f32[3,3,6,6], index: 3, kind: input, shape index: {}]   ;;  %s4771_s4 = inlined_call_operand.vmem [shape: f32[1,6], index: 4, kind: input, shape index: {}]   ;;  %s4772_s5 = inlined_call_operand.vmem [shape: f32[6,8], index: 5, kind: input, shape index: {}]   ;;  %s4773_s6 = inlined_call_operand.vmem [shape: f32[3], index: 6, kind: input, shape index: {}]   ;;  %s4774_s7 = inlined_call_operand.vmem [shape: f32[128,8], index: 7, kind: output, shape index: {}]  }
   0x1   :  { %s31_s26 = sshll.u32 %s4773_s6, 4  ;;  %s32_s26 = int_to_ptr.vmem [resolvable:$true] %s31_s26 }
   0x2   :  { %s3589_s27 = scalar_lea.vmem %s32_s26, 16  ;;  %p3594_p1 = scmp.lt.s32.totalorder %s32_s26, %s32_s26 }
   0x3   :  { %p3590_p0 = scmp.ne.s32.totalorder %s32_s26, %s3589_s27  ;;  %p3595_p2 = scmp.lt.s32.totalorder %s3589_s27, %s3589_s27 }
   0x5   :  { %p3596_p3 = por %p3595_p2, %p3594_p1 }
   0x7   :  { %p3597_p4 = pnand %p3596_p3, %p3590_p0 }
   0x9   :  { %3600 = shalt.err (!%p3597_p4)
}
   0xa   :  { %s3603_s28 = smov [#allocation3]  }
   0xb   :  { %34 = dma.vmem_to_smem %s32_s26, 16, %s3603_s28, [#allocation4]  }
   0xc   :  { %3601 = dma.done.wait [#allocation4], 16  }
   0xd   :  { %3602 = vsyncadd [#allocation4], 4294967280 }
   0xe   :  { %38 = sfence }
   0xf   :  { %v56_v0 = vld [vmem:[%s4768_s1 + $0x8] sm:$0xff]  ;;  %v55_v1 = vld [vmem:[%s4768_s1] sm:$0xff]  ;;  %vm64_vm0 = vcmask 130048   ;;  %v3671_v4 = vld [vmem:[%s4767_s0 + $0x10] sm:$0xff]  ;;  %vm308_vm1 = vcmask 48128   ;;  %vm310_vm2 = vcmask 41984  }
  0x10   :  { %v3659_v2 = vld [vmem:[%s4767_s0] sm:$0xff]  ;;  %3295 = vmatprep.subr.mxu0 %v56_v0  ;;  %v3666_v3 = vld [vmem:[%s4767_s0 + $0x8] sm:$0xff]  ;;  %v3680_v5 = vld [vmem:[%s4767_s0 + $0x18] sm:$0xff]  ;;  %v3604_v18 = vmov 0.0   ;;  %vm450_vm3 = vcmask 1045504   ;;  %s258_s20 = sld [smem:[#allocation3]] }
  0x11   :  { %3299 = vmatprep.mubr.msk.f32.mxu0 %vm64_vm0, %v3659_v2  ;;  %3296 = vmatpush3.msra.mxu0 %v56_v0  ;;  %v3685_v6 = vld [vmem:[%s4767_s0 + $0x20] sm:$0xff]  ;;  %v3694_v7 = vld [vmem:[%s4767_s0 + $0x28] sm:$0xff]  ;;  %v3699_v8 = vld [vmem:[%s4767_s0 + $0x30] sm:$0xff]  ;;  %314 = vst.msk [vmem:[#allocation2 + $0x20] sm:$0xff] %vm308_vm1, %v3604_v18  ;;  %s3605_s28 = smov 124  }
  0x12   :  { %3297 = vmatprep.subr.mxu0 %v55_v1  ;;  %v3708_v9 = vld [vmem:[%s4767_s0 + $0x38] sm:$0xff]  ;;  %v3713_v10 = vld [vmem:[%s4767_s0 + $0x40] sm:$0xff]  ;;  %v3722_v11 = vld [vmem:[%s4767_s0 + $0x48] sm:$0xff]  ;;  %315 = vst.msk [vmem:[#allocation2 + $0x28] sm:$0x3] %vm310_vm2, %v3604_v18  ;;  %2480 = vrot.lane.b32.xlu0 %v3659_v2, %s3605_s28 }
  0x13   :  { %3298 = vmatpush3.msra.mxu0 %v55_v1  ;;  %v3727_v12 = vld [vmem:[%s4767_s0 + $0x50] sm:$0xff]  ;;  %v3736_v13 = vld [vmem:[%s4767_s0 + $0x58] sm:$0xff]  ;;  %v3741_v14 = vld [vmem:[%s4767_s0 + $0x60] sm:$0xff]  ;;  %309 = vst.msk [vmem:[#allocation2] sm:$0xff] %vm308_vm1, %v3604_v18  ;;  %2484 = vrot.lane.b32.xlu1 %v3671_v4, %s3605_s28 }
  0x14   :  { %3300 = vmatmul.mubr.msk.f32.vlgmr.msra.gmra.mxu0 %vm64_vm0, %v3666_v3  ;;  %v3750_v15 = vld [vmem:[%s4767_s0 + $0x68] sm:$0xff]  ;;  %v3755_v16 = vld [vmem:[%s4767_s0 + $0x70] sm:$0xff]  ;;  %v3764_v17 = vld [vmem:[%s4767_s0 + $0x78] sm:$0xff]  ;;  %311 = vst.msk [vmem:[#allocation2 + $0x8] sm:$0x3] %vm310_vm2, %v3604_v18 }
  0x15   :  { %3302 = vmatprep.mubr.msk.f32.mxu0 %vm64_vm0, %v3671_v4  ;;  %312 = vst.msk [vmem:[#allocation2 + $0x10] sm:$0xff] %vm308_vm1, %v3604_v18  ;;  %316 = vst.msk [vmem:[#allocation2 + $0x30] sm:$0xff] %vm308_vm1, %v3604_v18  ;;  %v2926_v19 = vld [vmem:[%s4770_s3 + $0x8] sm:$0x3f]  ;;  %v2961_v21 = vld [vmem:[%s4770_s3 + $0x10] sm:$0x3f] }
  0x16   :  { %313 = vst.msk [vmem:[#allocation2 + $0x18] sm:$0x3] %vm310_vm2, %v3604_v18  ;;  %317 = vst.msk [vmem:[#allocation2 + $0x38] sm:$0x3] %vm310_vm2, %v3604_v18  ;;  %3323 = vmatprep.subr.msk.mxu0 %vm450_vm3, %v2926_v19  ;;  %3583 = vmatprep.subr.msk.mxu1 %vm450_vm3, %v2926_v19  ;;  %v3823_v22 = vld [vmem:[%s4770_s3] sm:$0x3f]  ;;  %v3832_v25 = vstv %s258_s20 }
  0x17   :  { %318 = vst.msk [vmem:[#allocation2 + $0x40] sm:$0xff] %vm308_vm1, %v3604_v18  ;;  %320 = vst.msk [vmem:[#allocation2 + $0x50] sm:$0xff] %vm308_vm1, %v3604_v18  ;;  %3324 = vmatpush3.msk.msra.mxu0 %vm450_vm3, %v2926_v19  ;;  %3584 = vmatpush3.msk.msra.mxu1 %vm450_vm3, %v2926_v19  ;;  %v3830_v23 = vld [vmem:[%s4769_s2] ss:$0 sm:$0xff] }
  0x18   :  { %3303 = vmatmul.mubr.msk.f32.gmra.mxu0 %vm64_vm0, %v3680_v5  ;;  %319 = vst.msk [vmem:[#allocation2 + $0x48] sm:$0x3] %vm310_vm2, %v3604_v18  ;;  %321 = vst.msk [vmem:[#allocation2 + $0x58] sm:$0x3] %vm310_vm2, %v3604_v18  ;;  %3375 = vmatprep.subr.msk.mxu0 %vm450_vm3, %v2961_v21  ;;  %v3859_v55 = vld [vmem:[%s4770_s3 + $0x20] sm:$0x3f] }
  0x19   :  { %3305 = vmatprep.mubr.msk.f32.mxu0 %vm64_vm0, %v3685_v6  ;;  %322 = vst.msk [vmem:[#allocation2 + $0x60] sm:$0xff] %vm308_vm1, %v3604_v18  ;;  %324 = vst.msk [vmem:[#allocation2 + $0x70] sm:$0xff] %vm308_vm1, %v3604_v18  ;;  %3349 = vmatprep.subr.msk.mxu1 %vm450_vm3, %v3823_v22 }
  0x1a   :  { %323 = vst.msk [vmem:[#allocation2 + $0x68] sm:$0x3] %vm310_vm2, %v3604_v18  ;;  %325 = vst.msk [vmem:[#allocation2 + $0x78] sm:$0x3] %vm310_vm2, %v3604_v18  ;;  %2482 = vrot.lane.b32.xlu0 %v3666_v3, %s3605_s28  ;;  %2486 = vrot.lane.b32.xlu1 %v3680_v5, %s3605_s28 }
  0x1b   :  { %326 = vst.msk [vmem:[#allocation2 + $0x80] sm:$0xff] %vm308_vm1, %v3604_v18  ;;  %328 = vst.msk [vmem:[#allocation2 + $0x90] sm:$0xff] %vm308_vm1, %v3604_v18  ;;  %v384_v20 = vld [vmem:[#allocation2 + $0x1] sm:$0xff] }
  0x1c   :  { %3306 = vmatmul.mubr.msk.f32.gmra.mxu0 %vm64_vm0, %v3694_v7  ;;  %327 = vst.msk [vmem:[#allocation2 + $0x88] sm:$0x3] %vm310_vm2, %v3604_v18  ;;  %329 = vst.msk [vmem:[#allocation2 + $0x98] sm:$0x3] %vm310_vm2, %v3604_v18 }
  0x1d   :  { %3308 = vmatprep.mubr.msk.f32.mxu0 %vm64_vm0, %v3699_v8  ;;  %330 = vst.msk [vmem:[#allocation2 + $0xa0] sm:$0xff] %vm308_vm1, %v3604_v18  ;;  %332 = vst.msk [vmem:[#allocation2 + $0xb0] sm:$0xff] %vm308_vm1, %v3604_v18 }
  0x1e   :  { %331 = vst.msk [vmem:[#allocation2 + $0xa8] sm:$0x3] %vm310_vm2, %v3604_v18  ;;  %333 = vst.msk [vmem:[#allocation2 + $0xb8] sm:$0x3] %vm310_vm2, %v3604_v18  ;;  %2490 = vrot.lane.b32.xlu1 %v3694_v7, %s3605_s28  ;;  %2488 = vrot.lane.b32.xlu0 %v3685_v6, %s3605_s28 }
  0x1f   :  { %334 = vst.msk [vmem:[#allocation2 + $0xc0] sm:$0xff] %vm308_vm1, %v3604_v18  ;;  %336 = vst.msk [vmem:[#allocation2 + $0xd0] sm:$0xff] %vm308_vm1, %v3604_v18 }
  0x20   :  { %3309 = vmatmul.mubr.msk.f32.gmra.mxu0 %vm64_vm0, %v3708_v9  ;;  %335 = vst.msk [vmem:[#allocation2 + $0xc8] sm:$0x3] %vm310_vm2, %v3604_v18  ;;  %337 = vst.msk [vmem:[#allocation2 + $0xd8] sm:$0x3] %vm310_vm2, %v3604_v18 }
  0x21   :  { %3311 = vmatprep.mubr.msk.f32.mxu0 %vm64_vm0, %v3713_v10  ;;  %338 = vst.msk [vmem:[#allocation2 + $0xe0] sm:$0xff] %vm308_vm1, %v3604_v18  ;;  %340 = vst.msk [vmem:[#allocation2 + $0xf0] sm:$0xff] %vm308_vm1, %v3604_v18 }
  0x22   :  { %339 = vst.msk [vmem:[#allocation2 + $0xe8] sm:$0x3] %vm310_vm2, %v3604_v18  ;;  %341 = vst.msk [vmem:[#allocation2 + $0xf8] sm:$0x3] %vm310_vm2, %v3604_v18  ;;  %2494 = vrot.lane.b32.xlu1 %v3708_v9, %s3605_s28  ;;  %2492 = vrot.lane.b32.xlu0 %v3699_v8, %s3605_s28 }
  0x23   :  { %342 = vst.msk [vmem:[#allocation2 + $0x100] sm:$0xff] %vm308_vm1, %v3604_v18  ;;  %344 = vst.msk [vmem:[#allocation2 + $0x110] sm:$0xff] %vm308_vm1, %v3604_v18 }
  0x24   :  { %3312 = vmatmul.mubr.msk.f32.gmra.mxu0 %vm64_vm0, %v3722_v11  ;;  %343 = vst.msk [vmem:[#allocation2 + $0x108] sm:$0x3] %vm310_vm2, %v3604_v18  ;;  %345 = vst.msk [vmem:[#allocation2 + $0x118] sm:$0x3] %vm310_vm2, %v3604_v18 }
  0x25   :  { %3314 = vmatprep.mubr.msk.f32.mxu0 %vm64_vm0, %v3727_v12  ;;  %346 = vst.msk [vmem:[#allocation2 + $0x120] sm:$0xff] %vm308_vm1, %v3604_v18  ;;  %348 = vst.msk [vmem:[#allocation2 + $0x130] sm:$0xff] %vm308_vm1, %v3604_v18 }
  0x26   :  { %347 = vst.msk [vmem:[#allocation2 + $0x128] sm:$0x3] %vm310_vm2, %v3604_v18  ;;  %349 = vst.msk [vmem:[#allocation2 + $0x138] sm:$0x3] %vm310_vm2, %v3604_v18  ;;  %2498 = vrot.lane.b32.xlu1 %v3722_v11, %s3605_s28  ;;  %2496 = vrot.lane.b32.xlu0 %v3713_v10, %s3605_s28 }
  0x28   :  { %3315 = vmatmul.mubr.msk.f32.gmra.mxu0 %vm64_vm0, %v3736_v13 }
  0x29   :  { %3317 = vmatprep.mubr.msk.f32.mxu0 %vm64_vm0, %v3741_v14 }
  0x2a   :  { %2502 = vrot.lane.b32.xlu1 %v3736_v13, %s3605_s28  ;;  %2500 = vrot.lane.b32.xlu0 %v3727_v12, %s3605_s28 }
  0x2c   :  { %3318 = vmatmul.mubr.msk.f32.gmra.mxu0 %vm64_vm0, %v3750_v15 }
  0x2d   :  { %3320 = vmatprep.mubr.msk.f32.mxu0 %vm64_vm0, %v3755_v16 }
  0x2e   :  { %2506 = vrot.lane.b32.xlu1 %v3750_v15, %s3605_s28  ;;  %2504 = vrot.lane.b32.xlu0 %v3741_v14, %s3605_s28 }
  0x30   :  { %3321 = vmatmul.mubr.msk.f32.gmra.mxu0 %vm64_vm0, %v3764_v17 }
  0x31   :  { %3325 = vmatprep.mubr.msk.f32.mxu0 %vm308_vm1, %v384_v20 }
  0x32   :  { %2510 = vrot.lane.b32.xlu1 %v3764_v17, %s3605_s28  ;;  %2508 = vrot.lane.b32.xlu0 %v3755_v16, %s3605_s28 }
  0xd4   :  { %v3301_v24 = vpop.f32.mrf.mxu0 }
  0xd5   :  { %v185_v26 = vadd.f32 %v3301_v24, %v3830_v23 }
  0xd6   :  { %v179_v27 = vpop.f32.mrf.mxu0 }
  0xd7   :  { %vm260_vm4 = vcmp.gt.f32.partialorder %v185_v26, 0.0  ;;  %v277_v28 = vmul.f32 %v3832_v25, %v185_v26  ;;  %v180_v29 = vadd.f32 %v3830_v23, %v179_v27 }
  0xd8   :  { %v3304_v30 = vpop.f32.mrf.mxu0 }
  0xd9   :  { %v293_v31 = vsel %vm260_vm4, %v185_v26, %v277_v28  ;;  %vm259_vm5 = vcmp.gt.f32.partialorder %v180_v29, 0.0  ;;  %v276_v32 = vmul.f32 %v3832_v25, %v180_v29  ;;  %v195_v33 = vadd.f32 %v3304_v30, %v3830_v23  ;;  %v795_v28 = vld [vmem:[#allocation2 + $0x2] sm:$0xff] }
  0xda   :  { %352 = vst.msk [vmem:[#allocation2 + $0x21] sm:$0xff] %vm308_vm1, %v293_v31  ;;  %v189_v34 = vpop.f32.mrf.mxu0 }
  0xdb   :  { %v292_v35 = vsel %vm259_vm5, %v180_v29, %v276_v32  ;;  %vm262_vm6 = vcmp.gt.f32.partialorder %v195_v33, 0.0  ;;  %v279_v36 = vmul.f32 %v3832_v25, %v195_v33  ;;  %v190_v37 = vadd.f32 %v3830_v23, %v189_v34 }
  0xdc   :  { %351 = vst.msk [vmem:[#allocation2 + $0x11] sm:$0xff] %vm308_vm1, %v292_v35  ;;  %v3307_v38 = vpop.f32.mrf.mxu0 }
  0xdd   :  { %v295_v39 = vsel %vm262_vm6, %v195_v33, %v279_v36  ;;  %vm261_vm7 = vcmp.gt.f32.partialorder %v190_v37, 0.0  ;;  %v278_v40 = vmul.f32 %v3832_v25, %v190_v37  ;;  %v205_v41 = vadd.f32 %v3307_v38, %v3830_v23  ;;  %v392_v38 = vld [vmem:[#allocation2 + $0xa1] sm:$0xff] }
  0xde   :  { %354 = vst.msk [vmem:[#allocation2 + $0x41] sm:$0xff] %vm308_vm1, %v295_v39  ;;  %v199_v42 = vpop.f32.mrf.mxu0 }
  0xdf   :  { %v294_v43 = vsel %vm261_vm7, %v190_v37, %v278_v40  ;;  %vm264_vm8 = vcmp.gt.f32.partialorder %v205_v41, 0.0  ;;  %v281_v44 = vmul.f32 %v3832_v25, %v205_v41  ;;  %v200_v45 = vadd.f32 %v3830_v23, %v199_v42 }
  0xe0   :  { %353 = vst.msk [vmem:[#allocation2 + $0x31] sm:$0xff] %vm308_vm1, %v294_v43  ;;  %v3310_v46 = vpop.f32.mrf.mxu0 }
  0xe1   :  { %v297_v47 = vsel %vm264_vm8, %v205_v41, %v281_v44  ;;  %vm263_vm9 = vcmp.gt.f32.partialorder %v200_v45, 0.0  ;;  %v280_v48 = vmul.f32 %v3832_v25, %v200_v45  ;;  %v215_v49 = vadd.f32 %v3310_v46, %v3830_v23  ;;  %v3864_v57 = vld [vmem:[#allocation2 + $0x21] sm:$0xff]  ;;  %v3912_v44 = vld [vmem:[%s4770_s3 + $0x18] sm:$0x3f] }
  0xe2   :  { %356 = vst.msk [vmem:[#allocation2 + $0x61] sm:$0xff] %vm308_vm1, %v297_v47  ;;  %v209_v50 = vpop.f32.mrf.mxu0  ;;  %v3919_v46 = vld [vmem:[#allocation2 + $0x22] sm:$0xff] }
  0xe3   :  { %v296_v51 = vsel %vm263_vm9, %v200_v45, %v280_v48  ;;  %vm266_vm10 = vcmp.gt.f32.partialorder %v215_v49, 0.0  ;;  %v283_v52 = vmul.f32 %v3832_v25, %v215_v49  ;;  %v210_v53 = vadd.f32 %v3830_v23, %v209_v50  ;;  %v3854_v54 = vld [vmem:[#allocation2 + $0x11] sm:$0xff] }
  0xe4   :  { %355 = vst.msk [vmem:[#allocation2 + $0x51] sm:$0xff] %vm308_vm1, %v296_v51  ;;  %v3313_v56 = vpop.f32.mrf.mxu0  ;;  %3326 = vmatmul.mubr.msk.f32.vlgmr.msra.gmra.mxu0 %vm308_vm1, %v3854_v54  ;;  %v3907_v43 = vld [vmem:[#allocation2 + $0x12] sm:$0xff] }
  0xe5   :  { %v299_v58 = vsel %vm266_vm10, %v215_v49, %v283_v52  ;;  %vm265_vm11 = vcmp.gt.f32.partialorder %v210_v53, 0.0  ;;  %v282_v59 = vmul.f32 %v3832_v25, %v210_v53  ;;  %v225_v60 = vadd.f32 %v3313_v56, %v3830_v23  ;;  %3328 = vmatprep.mubr.msk.f32.mxu0 %vm308_vm1, %v3864_v57  ;;  %3376 = vmatpush3.msk.msra.mxu0 %vm450_vm3, %v2961_v21  ;;  %v3881_v19 = vld [vmem:[#allocation2 + $0x41] sm:$0xff] }
  0xe6   :  { %358 = vst.msk [vmem:[#allocation2 + $0x81] sm:$0xff] %vm308_vm1, %v299_v58  ;;  %v219_v61 = vpop.f32.mrf.mxu0  ;;  %3427 = vmatprep.subr.msk.mxu0 %vm450_vm3, %v3859_v55  ;;  %v3942_v58 = vld [vmem:[%s4770_s3 + $0x30] sm:$0x3f] }
  0xe7   :  { %v298_v62 = vsel %vm265_vm11, %v210_v53, %v282_v59  ;;  %vm268_vm12 = vcmp.gt.f32.partialorder %v225_v60, 0.0  ;;  %v285_v63 = vmul.f32 %v3832_v25, %v225_v60  ;;  %v220_v0 = vadd.f32 %v3830_v23, %v219_v61  ;;  %v3876_v1 = vld [vmem:[#allocation2 + $0x31] sm:$0xff]  ;;  %v3951_v59 = vld [vmem:[#allocation2 + $0x42] sm:$0xff] }
  0xe8   :  { %357 = vst.msk [vmem:[#allocation2 + $0x71] sm:$0xff] %vm308_vm1, %v298_v62  ;;  %v3316_v18 = vpop.f32.mrf.mxu0  ;;  %3329 = vmatmul.mubr.msk.f32.gmra.mxu0 %vm308_vm1, %v3876_v1 }
  0xe9   :  { %v301_v20 = vsel %vm268_vm12, %v225_v60, %v285_v63  ;;  %vm267_vm13 = vcmp.gt.f32.partialorder %v220_v0, 0.0  ;;  %v284_v21 = vmul.f32 %v3832_v25, %v220_v0  ;;  %v235_v24 = vadd.f32 %v3316_v18, %v3830_v23  ;;  %3331 = vmatprep.mubr.msk.f32.mxu0 %vm308_vm1, %v3881_v19  ;;  %v3887_v26 = vld [vmem:[#allocation2 + $0x61] sm:$0xff] }
  0xea   :  { %360 = vst.msk [vmem:[#allocation2 + $0xc1] sm:$0xff] %vm308_vm1, %v301_v20  ;;  %v229_v27 = vpop.f32.mrf.mxu0  ;;  %3334 = vmatprep.mubr.msk.f32.mxu1 %vm308_vm1, %v3887_v26  ;;  %v803_v18 = vld [vmem:[#allocation2 + $0xa2] sm:$0xff] }
  0xeb   :  { %v300_v29 = vsel %vm267_vm13, %v220_v0, %v284_v21  ;;  %vm270_vm14 = vcmp.gt.f32.partialorder %v235_v24, 0.0  ;;  %v287_v30 = vmul.f32 %v3832_v25, %v235_v24  ;;  %v230_v31 = vadd.f32 %v3830_v23, %v229_v27  ;;  %v3894_v32 = vld [vmem:[#allocation2 + $0x51] sm:$0xff]  ;;  %v3972_v0 = vld [vmem:[#allocation2 + $0x62] sm:$0xff] }
  0xec   :  { %359 = vst.msk [vmem:[#allocation2 + $0xb1] sm:$0xff] %vm308_vm1, %v300_v29  ;;  %v3319_v33 = vpop.f32.mrf.mxu0  ;;  %3332 = vmatmul.mubr.msk.f32.gmra.mxu0 %vm308_vm1, %v3894_v32  ;;  %v3963_v63 = vld [vmem:[#allocation2 + $0x52] sm:$0xff]  ;;  %v367_v27 = vld [vmem:[#allocation2] sm:$0xff] }
  0xed   :  { %v303_v34 = vsel %vm270_vm14, %v235_v24, %v287_v30  ;;  %vm269_vm15 = vcmp.gt.f32.partialorder %v230_v31, 0.0  ;;  %v286_v35 = vmul.f32 %v3832_v25, %v230_v31  ;;  %v245_v36 = vadd.f32 %v3319_v33, %v3830_v23  ;;  %3377 = vmatprep.mubr.msk.f32.mxu0 %vm308_vm1, %v795_v28 }
  0xee   :  { %362 = vst.msk [vmem:[#allocation2 + $0xe1] sm:$0xff] %vm308_vm1, %v303_v34  ;;  %v239_v37 = vpop.f32.mrf.mxu0  ;;  %v4015_v34 = vld [vmem:[%s4770_s3 + $0x28] sm:$0x3f] }
  0xef   :  { %v302_v39 = vsel %vm269_vm15, %v230_v31, %v286_v35  ;;  %vm272_vm0 = vcmp.gt.f32.partialorder %v245_v36, 0.0  ;;  %v289_v40 = vmul.f32 %v3832_v25, %v245_v36  ;;  %v240_v41 = vadd.f32 %v3830_v23, %v239_v37  ;;  %v3905_v42 = vld [vmem:[#allocation2 + $0x71] sm:$0xff]  ;;  %v4021_v35 = vld [vmem:[#allocation2 + $0x20] sm:$0xff] }
  0xf0   :  { %361 = vst.msk [vmem:[#allocation2 + $0xd1] sm:$0xff] %vm308_vm1, %v302_v39  ;;  %v3322_v45 = vpop.f32.mrf.mxu0  ;;  %3335 = vmatmul.mubr.msk.f32.vlgmr.msra.gmra.mxu1 %vm308_vm1, %v3905_v42  ;;  %3378 = vmatmul.mubr.msk.f32.vlgmr.msra.gmra.mxu0 %vm308_vm1, %v3907_v43  ;;  %v3980_v21 = vld [vmem:[#allocation2 + $0x72] sm:$0xff]  ;;  %v4045_v39 = vld [vmem:[#allocation2 + $0x40] sm:$0xff] }
  0xf1   :  { %v305_v47 = vsel %vm272_vm0, %v245_v36, %v289_v40  ;;  %vm271_vm2 = vcmp.gt.f32.partialorder %v240_v41, 0.0  ;;  %v288_v48 = vmul.f32 %v3832_v25, %v240_v41  ;;  %v255_v49 = vadd.f32 %v3322_v45, %v3830_v23  ;;  %3350 = vmatpush3.msk.msra.mxu1 %vm450_vm3, %v3823_v22  ;;  %3380 = vmatprep.mubr.msk.f32.mxu0 %vm308_vm1, %v3919_v46  ;;  %v3935_v22 = vld [vmem:[#allocation2 + $0x32] sm:$0xff]  ;;  %v3999_v30 = vld [vmem:[#allocation2 + $0xc2] sm:$0xff] }
  0xf2   :  { %364 = vst.msk [vmem:[#allocation2 + $0x101] sm:$0xff] %vm308_vm1, %v305_v47  ;;  %v249_v50 = vpop.f32.mrf.mxu0  ;;  %3337 = vmatprep.mubr.msk.f32.mxu1 %vm308_vm1, %v392_v38  ;;  %3401 = vmatprep.subr.msk.mxu1 %vm450_vm3, %v3912_v44  ;;  %v4008_v31 = vld [vmem:[#allocation2 + $0x10] sm:$0xff]  ;;  %v4065_v45 = vld [vmem:[#allocation2 + $0x60] sm:$0xff] }
  0xf3   :  { %v304_v51 = vsel %vm271_vm2, %v240_v41, %v288_v48  ;;  %vm274_vm4 = vcmp.gt.f32.partialorder %v255_v49, 0.0  ;;  %v291_v52 = vmul.f32 %v3832_v25, %v255_v49  ;;  %v250_v53 = vadd.f32 %v3830_v23, %v249_v50  ;;  %v3933_v56 = vld [vmem:[#allocation2 + $0xb1] sm:$0xff]  ;;  %3428 = vmatpush3.msk.msra.mxu0 %vm450_vm3, %v3859_v55  ;;  %v3949_v23 = vld [vmem:[#allocation2 + $0xc1] sm:$0xff] }
  0xf4   :  { %363 = vst.msk [vmem:[#allocation2 + $0xf1] sm:$0xff] %vm308_vm1, %v304_v51  ;;  %3338 = vmatmul.mubr.msk.f32.gmra.mxu1 %vm308_vm1, %v3933_v56  ;;  %3381 = vmatmul.mubr.msk.f32.gmra.mxu0 %vm308_vm1, %v3935_v22  ;;  %v3993_v29 = vld [vmem:[#allocation2 + $0xb2] sm:$0xff]  ;;  %v375_v47 = vld [vmem:[#allocation2 + $0xa0] sm:$0xff] }
  0xf5   :  { %v307_v60 = vsel %vm274_vm4, %v255_v49, %v291_v52  ;;  %vm273_vm5 = vcmp.gt.f32.partialorder %v250_v53, 0.0  ;;  %v290_v55 = vmul.f32 %v3832_v25, %v250_v53  ;;  %3340 = vmatprep.mubr.msk.f32.mxu1 %vm308_vm1, %v3949_v23  ;;  %3383 = vmatprep.mubr.msk.f32.mxu0 %vm308_vm1, %v3951_v59  ;;  %v3970_v25 = vld [vmem:[#allocation2 + $0xe1] sm:$0xff]  ;;  %v4033_v37 = vld [vmem:[#allocation2 + $0x30] sm:$0xff] }
  0xf6   :  { %366 = vst.msk [vmem:[#allocation2 + $0x121] sm:$0xff] %vm308_vm1, %v307_v60  ;;  %3479 = vmatprep.subr.msk.mxu0 %vm450_vm3, %v3942_v58  ;;  %v4027_v36 = vld [vmem:[#allocation2 + $0xe2] sm:$0xff]  ;;  %v4053_v41 = vld [vmem:[#allocation2 + $0x50] sm:$0xff] }
  0xf7   :  { %v306_v61 = vsel %vm273_vm5, %v250_v53, %v290_v55  ;;  %v3961_v62 = vld [vmem:[#allocation2 + $0xd1] sm:$0xff]  ;;  %v3069_v49 = vld [vmem:[%s4770_s3 + $0x40] sm:$0x3f] }
  0xf8   :  { %365 = vst.msk [vmem:[#allocation2 + $0x111] sm:$0xff] %vm308_vm1, %v306_v61  ;;  %3341 = vmatmul.mubr.msk.f32.gmra.mxu1 %vm308_vm1, %v3961_v62  ;;  %3384 = vmatmul.mubr.msk.f32.gmra.mxu0 %vm308_vm1, %v3963_v63  ;;  %v4010_v33 = vld [vmem:[#allocation2 + $0xd2] sm:$0xff]  ;;  %v377_v50 = vld [vmem:[#allocation2 + $0xc0] sm:$0xff] }
  0xf9   :  { %3343 = vmatprep.mubr.msk.f32.mxu1 %vm308_vm1, %v3970_v25  ;;  %3386 = vmatprep.mubr.msk.f32.mxu0 %vm308_vm1, %v3972_v0  ;;  %v3986_v24 = vld [vmem:[#allocation2 + $0x101] sm:$0xff]  ;;  %v4071_v48 = vld [vmem:[#allocation2 + $0x70] sm:$0xff] }
  0xfa   :  { %v4047_v40 = vld [vmem:[#allocation2 + $0x102] sm:$0xff]  ;;  %v378_v51 = vld [vmem:[#allocation2 + $0xd0] sm:$0xff] }
  0xfb   :  { %v3978_v20 = vld [vmem:[#allocation2 + $0xf1] sm:$0xff]  ;;  %v379_v52 = vld [vmem:[#allocation2 + $0xe0] sm:$0xff] }
  0xfc   :  { %3344 = vmatmul.mubr.msk.f32.gmra.mxu1 %vm308_vm1, %v3978_v20  ;;  %3387 = vmatmul.mubr.msk.f32.gmra.mxu0 %vm308_vm1, %v3980_v21  ;;  %v4035_v38 = vld [vmem:[#allocation2 + $0xf2] sm:$0xff]  ;;  %v381_v60 = vld [vmem:[#allocation2 + $0x100] sm:$0xff] }
  0xfd   :  { %3346 = vmatprep.mubr.msk.f32.mxu1 %vm308_vm1, %v3986_v24  ;;  %3389 = vmatprep.mubr.msk.f32.mxu0 %vm308_vm1, %v803_v18  ;;  %v380_v53 = vld [vmem:[#allocation2 + $0xf0] sm:$0xff]  ;;  %v4155_v61 = vld [vmem:[#allocation2 + $0x121] sm:$0xff] }
  0xfe   :  { %v1032_v18 = vld [vmem:[#allocation2 + $0x80] sm:$0xff] }
  0xff   :  { %v3991_v28 = vld [vmem:[#allocation2 + $0x111] sm:$0xff] }
 0x100   :  { %3347 = vmatmul.mubr.msk.f32.gmra.mxu1 %vm308_vm1, %v3991_v28  ;;  %3390 = vmatmul.mubr.msk.f32.gmra.mxu0 %vm308_vm1, %v3993_v29  ;;  %v382_v55 = vld [vmem:[#allocation2 + $0x110] sm:$0xff] }
 0x101   :  { %3392 = vmatprep.mubr.msk.f32.mxu0 %vm308_vm1, %v3999_v30  ;;  %3351 = vmatprep.mubr.msk.f32.mxu1 %vm308_vm1, %v367_v27  ;;  %v1723_v27 = vld [vmem:[#allocation2 + $0x90] sm:$0xff] }
 0x104   :  { %3352 = vmatmul.mubr.msk.f32.vlgmr.msra.gmra.mxu1 %vm308_vm1, %v4008_v31  ;;  %3393 = vmatmul.mubr.msk.f32.gmra.mxu0 %vm308_vm1, %v4010_v33 }
 0x105   :  { %3402 = vmatpush3.msk.msra.mxu1 %vm450_vm3, %v3912_v44  ;;  %3354 = vmatprep.mubr.msk.f32.mxu1 %vm308_vm1, %v4021_v35  ;;  %v4055_v44 = vld [vmem:[#allocation2 + $0x112] sm:$0xff] }
 0x106   :  { %3395 = vmatprep.mubr.msk.f32.mxu0 %vm308_vm1, %v4027_v36  ;;  %3453 = vmatprep.subr.msk.mxu1 %vm450_vm3, %v4015_v34 }
 0x108   :  { %3355 = vmatmul.mubr.msk.f32.gmra.mxu1 %vm308_vm1, %v4033_v37  ;;  %3396 = vmatmul.mubr.msk.f32.gmra.mxu0 %vm308_vm1, %v4035_v38 }
 0x109   :  { %3357 = vmatprep.mubr.msk.f32.mxu1 %vm308_vm1, %v4045_v39  ;;  %3398 = vmatprep.mubr.msk.f32.mxu0 %vm308_vm1, %v4047_v40 }
 0x10c   :  { %3358 = vmatmul.mubr.msk.f32.gmra.mxu1 %vm308_vm1, %v4053_v41  ;;  %3399 = vmatmul.mubr.msk.f32.gmra.mxu0 %vm308_vm1, %v4055_v44 }
 0x10d   :  { %3360 = vmatprep.mubr.msk.f32.mxu1 %vm308_vm1, %v4065_v45  ;;  %3429 = vmatprep.mubr.msk.f32.mxu0 %vm308_vm1, %v3854_v54  ;;  %v376_v54 = vld [vmem:[#allocation2 + $0xb0] sm:$0xff] }
 0x110   :  { %3361 = vmatmul.mubr.msk.f32.gmra.mxu1 %vm308_vm1, %v4071_v48  ;;  %3430 = vmatmul.mubr.msk.f32.vlgmr.msra.gmra.mxu0 %vm308_vm1, %v3864_v57 }
 0x111   :  { %3432 = vmatprep.mubr.msk.f32.mxu0 %vm308_vm1, %v3876_v1  ;;  %3363 = vmatprep.mubr.msk.f32.mxu1 %vm308_vm1, %v375_v47 }
 0x112   :  { %3480 = vmatpush3.msk.msra.mxu0 %vm450_vm3, %v3942_v58  ;;  %v4110_v58 = vld [vmem:[#allocation2 + $0x81] sm:$0xff] }
 0x113   :  { %3531 = vmatprep.subr.msk.mxu0 %vm450_vm3, %v3069_v49 }
 0x114   :  { %3364 = vmatmul.mubr.msk.f32.gmra.mxu1 %vm308_vm1, %v376_v54  ;;  %3433 = vmatmul.mubr.msk.f32.gmra.mxu0 %vm308_vm1, %v3881_v19 }
 0x115   :  { %3366 = vmatprep.mubr.msk.f32.mxu1 %vm308_vm1, %v377_v50  ;;  %3435 = vmatprep.mubr.msk.f32.mxu0 %vm308_vm1, %v3894_v32 }
 0x118   :  { %3367 = vmatmul.mubr.msk.f32.gmra.mxu1 %vm308_vm1, %v378_v51  ;;  %3436 = vmatmul.mubr.msk.f32.gmra.mxu0 %vm308_vm1, %v3887_v26 }
 0x119   :  { %3369 = vmatprep.mubr.msk.f32.mxu1 %vm308_vm1, %v379_v52  ;;  %3438 = vmatprep.mubr.msk.f32.mxu0 %vm308_vm1, %v3905_v42 }
 0x11c   :  { %3370 = vmatmul.mubr.msk.f32.gmra.mxu1 %vm308_vm1, %v380_v53  ;;  %3439 = vmatmul.mubr.msk.f32.gmra.mxu0 %vm308_vm1, %v4110_v58 }
 0x11d   :  { %3372 = vmatprep.mubr.msk.f32.mxu1 %vm308_vm1, %v381_v60  ;;  %3441 = vmatprep.mubr.msk.f32.mxu0 %vm308_vm1, %v3933_v56  ;;  %v3051_v56 = vld [vmem:[%s4770_s3 + $0x38] sm:$0x3f]  ;;  %s3606_s3 = smov 120  }
 0x120   :  { %3373 = vmatmul.mubr.msk.f32.gmra.mxu1 %vm308_vm1, %v382_v55  ;;  %3442 = vmatmul.mubr.msk.f32.gmra.mxu0 %vm308_vm1, %v3949_v23 }
 0x121   :  { %3403 = vmatprep.mubr.msk.f32.mxu1 %vm308_vm1, %v4008_v31  ;;  %3444 = vmatprep.mubr.msk.f32.mxu0 %vm308_vm1, %v3961_v62  ;;  %v1040_v31 = vld [vmem:[#allocation2 + $0x120] sm:$0xff] }
 0x124   :  { %3404 = vmatmul.mubr.msk.f32.vlgmr.msra.gmra.mxu1 %vm308_vm1, %v4021_v35  ;;  %3445 = vmatmul.mubr.msk.f32.gmra.mxu0 %vm308_vm1, %v3970_v25 }
 0x125   :  { %3454 = vmatpush3.msk.msra.mxu1 %vm450_vm3, %v4015_v34  ;;  %3406 = vmatprep.mubr.msk.f32.mxu1 %vm308_vm1, %v4033_v37  ;;  %v1492_v34 = vld [vmem:[#allocation2 + $0x82] sm:$0xff] }
 0x126   :  { %3447 = vmatprep.mubr.msk.f32.mxu0 %vm308_vm1, %v3978_v20  ;;  %3505 = vmatprep.subr.msk.mxu1 %vm450_vm3, %v3051_v56 }
 0x128   :  { %3407 = vmatmul.mubr.msk.f32.gmra.mxu1 %vm308_vm1, %v4045_v39  ;;  %3448 = vmatmul.mubr.msk.f32.gmra.mxu0 %vm308_vm1, %v3986_v24 }
 0x129   :  { %3409 = vmatprep.mubr.msk.f32.mxu1 %vm308_vm1, %v4053_v41  ;;  %3450 = vmatprep.mubr.msk.f32.mxu0 %vm308_vm1, %v3991_v28 }
 0x12c   :  { %3410 = vmatmul.mubr.msk.f32.gmra.mxu1 %vm308_vm1, %v4065_v45  ;;  %3451 = vmatmul.mubr.msk.f32.gmra.mxu0 %vm308_vm1, %v4155_v61 }
 0x12d   :  { %3412 = vmatprep.mubr.msk.f32.mxu1 %vm308_vm1, %v4071_v48  ;;  %3481 = vmatprep.mubr.msk.f32.mxu0 %vm308_vm1, %v4021_v35 }
 0x130   :  { %3413 = vmatmul.mubr.msk.f32.gmra.mxu1 %vm308_vm1, %v1032_v18  ;;  %3482 = vmatmul.mubr.msk.f32.vlgmr.msra.gmra.mxu0 %vm308_vm1, %v4033_v37 }
 0x131   :  { %3415 = vmatprep.mubr.msk.f32.mxu1 %vm308_vm1, %v376_v54  ;;  %3484 = vmatprep.mubr.msk.f32.mxu0 %vm308_vm1, %v4045_v39 }
 0x132   :  { %3532 = vmatpush3.msk.msra.mxu0 %vm450_vm3, %v3069_v49 }
 0x134   :  { %3416 = vmatmul.mubr.msk.f32.gmra.mxu1 %vm308_vm1, %v377_v50  ;;  %3485 = vmatmul.mubr.msk.f32.gmra.mxu0 %vm308_vm1, %v4053_v41 }
 0x135   :  { %3418 = vmatprep.mubr.msk.f32.mxu1 %vm308_vm1, %v378_v51  ;;  %3487 = vmatprep.mubr.msk.f32.mxu0 %vm308_vm1, %v4065_v45 }
 0x138   :  { %3419 = vmatmul.mubr.msk.f32.gmra.mxu1 %vm308_vm1, %v379_v52  ;;  %3488 = vmatmul.mubr.msk.f32.gmra.mxu0 %vm308_vm1, %v4071_v48 }
 0x139   :  { %3421 = vmatprep.mubr.msk.f32.mxu1 %vm308_vm1, %v380_v53  ;;  %3490 = vmatprep.mubr.msk.f32.mxu0 %vm308_vm1, %v1032_v18 }
 0x13c   :  { %3422 = vmatmul.mubr.msk.f32.gmra.mxu1 %vm308_vm1, %v381_v60  ;;  %3491 = vmatmul.mubr.msk.f32.gmra.mxu0 %vm308_vm1, %v1723_v27 }
 0x13d   :  { %3424 = vmatprep.mubr.msk.f32.mxu1 %vm308_vm1, %v382_v55  ;;  %3493 = vmatprep.mubr.msk.f32.mxu0 %vm308_vm1, %v377_v50 }
 0x140   :  { %3425 = vmatmul.mubr.msk.f32.gmra.mxu1 %vm308_vm1, %v1040_v31  ;;  %3494 = vmatmul.mubr.msk.f32.gmra.mxu0 %vm308_vm1, %v378_v51 }
 0x141   :  { %3455 = vmatprep.mubr.msk.f32.mxu1 %vm308_vm1, %v3907_v43  ;;  %3496 = vmatprep.mubr.msk.f32.mxu0 %vm308_vm1, %v379_v52  ;;  %v1731_v43 = vld [vmem:[#allocation2 + $0x130] sm:$0xff] }
 0x144   :  { %3456 = vmatmul.mubr.msk.f32.vlgmr.msra.gmra.mxu1 %vm308_vm1, %v3919_v46  ;;  %3497 = vmatmul.mubr.msk.f32.gmra.mxu0 %vm308_vm1, %v380_v53 }
 0x145   :  { %3506 = vmatpush3.msk.msra.mxu1 %vm450_vm3, %v3051_v56  ;;  %3458 = vmatprep.mubr.msk.f32.mxu1 %vm308_vm1, %v3935_v22 }
 0x146   :  { %3499 = vmatprep.mubr.msk.f32.mxu0 %vm308_vm1, %v381_v60 }
 0x148   :  { %3459 = vmatmul.mubr.msk.f32.gmra.mxu1 %vm308_vm1, %v3951_v59  ;;  %3500 = vmatmul.mubr.msk.f32.gmra.mxu0 %vm308_vm1, %v382_v55 }
 0x149   :  { %3461 = vmatprep.mubr.msk.f32.mxu1 %vm308_vm1, %v3963_v63  ;;  %3502 = vmatprep.mubr.msk.f32.mxu0 %vm308_vm1, %v1040_v31 }
 0x14c   :  { %3462 = vmatmul.mubr.msk.f32.gmra.mxu1 %vm308_vm1, %v3972_v0  ;;  %3503 = vmatmul.mubr.msk.f32.gmra.mxu0 %vm308_vm1, %v1731_v43 }
 0x14d   :  { %3464 = vmatprep.mubr.msk.f32.mxu1 %vm308_vm1, %v3980_v21  ;;  %3533 = vmatprep.mubr.msk.f32.mxu0 %vm308_vm1, %v3919_v46  ;;  %v2183_v46 = vld [vmem:[#allocation2 + $0x92] sm:$0xff] }
 0x150   :  { %3465 = vmatmul.mubr.msk.f32.gmra.mxu1 %vm308_vm1, %v1492_v34  ;;  %3534 = vmatmul.mubr.msk.f32.vlgmr.msra.gmra.mxu0 %vm308_vm1, %v3935_v22  ;;  %v1500_v22 = vld [vmem:[#allocation2 + $0x122] sm:$0xff] }
 0x151   :  { %3467 = vmatprep.mubr.msk.f32.mxu1 %vm308_vm1, %v3993_v29  ;;  %3536 = vmatprep.mubr.msk.f32.mxu0 %vm308_vm1, %v3951_v59 }
 0x154   :  { %3468 = vmatmul.mubr.msk.f32.gmra.mxu1 %vm308_vm1, %v3999_v30  ;;  %3537 = vmatmul.mubr.msk.f32.gmra.mxu0 %vm308_vm1, %v3963_v63 }
 0x155   :  { %3470 = vmatprep.mubr.msk.f32.mxu1 %vm308_vm1, %v4010_v33  ;;  %3539 = vmatprep.mubr.msk.f32.mxu0 %vm308_vm1, %v3972_v0 }
 0x158   :  { %3471 = vmatmul.mubr.msk.f32.gmra.mxu1 %vm308_vm1, %v4027_v36  ;;  %3540 = vmatmul.mubr.msk.f32.gmra.mxu0 %vm308_vm1, %v3980_v21 }
 0x159   :  { %3473 = vmatprep.mubr.msk.f32.mxu1 %vm308_vm1, %v4035_v38  ;;  %3542 = vmatprep.mubr.msk.f32.mxu0 %vm308_vm1, %v1492_v34 }
 0x15c   :  { %3474 = vmatmul.mubr.msk.f32.gmra.mxu1 %vm308_vm1, %v4047_v40  ;;  %3543 = vmatmul.mubr.msk.f32.gmra.mxu0 %vm308_vm1, %v2183_v46 }
 0x15d   :  { %3476 = vmatprep.mubr.msk.f32.mxu1 %vm308_vm1, %v4055_v44  ;;  %3545 = vmatprep.mubr.msk.f32.mxu0 %vm308_vm1, %v3999_v30 }
 0x160   :  { %3477 = vmatmul.mubr.msk.f32.gmra.mxu1 %vm308_vm1, %v1500_v22  ;;  %3546 = vmatmul.mubr.msk.f32.gmra.mxu0 %vm308_vm1, %v4010_v33 }
 0x161   :  { %3507 = vmatprep.mubr.msk.f32.mxu1 %vm308_vm1, %v3864_v57  ;;  %3548 = vmatprep.mubr.msk.f32.mxu0 %vm308_vm1, %v4027_v36  ;;  %v2191_v57 = vld [vmem:[#allocation2 + $0x132] sm:$0xff] }
 0x164   :  { %3508 = vmatmul.mubr.msk.f32.vlgmr.msra.gmra.mxu1 %vm308_vm1, %v3876_v1  ;;  %3549 = vmatmul.mubr.msk.f32.gmra.mxu0 %vm308_vm1, %v4035_v38  ;;  %v1953_v1 = vld [vmem:[#allocation2 + $0x91] sm:$0xff] }
 0x165   :  { %3510 = vmatprep.mubr.msk.f32.mxu1 %vm308_vm1, %v3881_v19  ;;  %3551 = vmatprep.mubr.msk.f32.mxu0 %vm308_vm1, %v4047_v40  ;;  %v1961_v19 = vld [vmem:[#allocation2 + $0x131] sm:$0xff] }
 0x168   :  { %3511 = vmatmul.mubr.msk.f32.gmra.mxu1 %vm308_vm1, %v3894_v32  ;;  %3552 = vmatmul.mubr.msk.f32.gmra.mxu0 %vm308_vm1, %v4055_v44 }
 0x169   :  { %3513 = vmatprep.mubr.msk.f32.mxu1 %vm308_vm1, %v3887_v26  ;;  %3554 = vmatprep.mubr.msk.f32.mxu0 %vm308_vm1, %v1500_v22  ;;  %v2481_v26 = vpop.permute.xlu0 %2480 }
 0x16a   :  { %v4285_v32 = vmax.f32 %v3659_v2, %v2481_v26 }
 0x16c   :  { %3514 = vmatmul.mubr.msk.f32.gmra.mxu1 %vm308_vm1, %v3905_v42  ;;  %3555 = vmatmul.mubr.msk.f32.gmra.mxu0 %vm308_vm1, %v2191_v57  ;;  %4791 = vst [vmem:[#allocation6_spill] sm:$0xff] %v4285_v32  ;;  %v2485_v42 = vpop.permute.xlu1 %2484 }
 0x16d   :  { %3516 = vmatprep.mubr.msk.f32.mxu1 %vm308_vm1, %v4110_v58  ;;  %2560 = vrot.lane.b32.xlu0 %v4285_v32, %s3606_s3  ;;  %v4290_v59 = vmax.f32 %v3671_v4, %v2485_v42 }
 0x16f   :  { %4792 = vst [vmem:[#allocation7_spill] sm:$0xff] %v4290_v59 }
 0x170   :  { %3517 = vmatmul.mubr.msk.f32.gmra.mxu1 %vm308_vm1, %v1953_v1  ;;  %v2487_v63 = vpop.permute.xlu1 %2486 }
 0x171   :  { %3519 = vmatprep.mubr.msk.f32.mxu1 %vm308_vm1, %v3949_v23  ;;  %v2483_v23 = vpop.permute.xlu0 %2482  ;;  %2564 = vrot.lane.b32.xlu0 %v4290_v59, %s3606_s3  ;;  %v4300_v2 = vmax.f32 %v3680_v5, %v2487_v63 }
 0x173   :  { %4794 = vst [vmem:[#allocation9_spill] sm:$0xff] %v4300_v2 }
 0x174   :  { %3520 = vmatmul.mubr.msk.f32.gmra.mxu1 %vm308_vm1, %v3961_v62  ;;  %v4293_v62 = vmax.f32 %v3666_v3, %v2483_v23 }
 0x175   :  { %3522 = vmatprep.mubr.msk.f32.mxu1 %vm308_vm1, %v3970_v25  ;;  %v2491_v25 = vpop.permute.xlu1 %2490  ;;  %v2489_v0 = vpop.permute.xlu0 %2488 }
 0x176   :  { %4793 = vst [vmem:[#allocation8_spill] sm:$0xff] %v4293_v62  ;;  %2562 = vrot.lane.b32.xlu1 %v4293_v62, %s3606_s3  ;;  %v4305_v4 = vmax.f32 %v3694_v7, %v2491_v25  ;;  %v4308_v3 = vmax.f32 %v3685_v6, %v2489_v0 }
 0x178   :  { %3523 = vmatmul.mubr.msk.f32.gmra.mxu1 %vm308_vm1, %v3978_v20  ;;  %4795 = vst [vmem:[#allocation10_spill] sm:$0xff] %v4305_v4  ;;  %4796 = vst [vmem:[#allocation11_spill] sm:$0xff] %v4308_v3  ;;  %v2479_v20 = vld [vmem:[%s4772_s5] sm:$0x3f]  ;;  %2568 = vrot.lane.b32.xlu0 %v4308_v3, %s3606_s3  ;;  %s3088_s5 = sld [smem:[#allocation3 + $0x1]] }
 0x179   :  { %3525 = vmatprep.mubr.msk.f32.mxu1 %vm308_vm1, %v3986_v24  ;;  %3557 = vmatprep.subr.msk.mxu1 %vm450_vm3, %v2479_v20  ;;  %v2495_v5 = vpop.permute.xlu1 %2494  ;;  %v2493_v7 = vpop.permute.xlu0 %2492 }
 0x17a   :  { %2566 = vrot.lane.b32.xlu1 %v4300_v2, %s3606_s3  ;;  %3558 = vmatpush3.msk.msra.mxu1 %vm450_vm3, %v2479_v20  ;;  %v4320_v21 = vmax.f32 %v3708_v9, %v2495_v5  ;;  %v4323_v6 = vmax.f32 %v3699_v8, %v2493_v7 }
 0x17c   :  { %3526 = vmatmul.mubr.msk.f32.gmra.mxu1 %vm308_vm1, %v3991_v28  ;;  %4797 = vst [vmem:[#allocation12_spill] sm:$0xff] %v4320_v21  ;;  %4798 = vst [vmem:[#allocation13_spill] sm:$0xff] %v4323_v6  ;;  %2572 = vrot.lane.b32.xlu0 %v4323_v6, %s3606_s3 }
 0x17d   :  { %3528 = vmatprep.mubr.msk.f32.mxu1 %vm308_vm1, %v4155_v61  ;;  %v2499_v24 = vpop.permute.xlu1 %2498  ;;  %v2497_v28 = vpop.permute.xlu0 %2496 }
 0x17e   :  { %2570 = vrot.lane.b32.xlu1 %v4305_v4, %s3606_s3  ;;  %v4330_v29 = vmax.f32 %v3722_v11, %v2499_v24  ;;  %v4333_v30 = vmax.f32 %v3713_v10, %v2497_v28 }
 0x180   :  { %3529 = vmatmul.mubr.msk.f32.gmra.mxu1 %vm308_vm1, %v1961_v19  ;;  %4799 = vst [vmem:[#allocation14_spill] sm:$0xff] %v4330_v29  ;;  %4800 = vst [vmem:[#allocation15_spill] sm:$0xff] %v4333_v30  ;;  %2576 = vrot.lane.b32.xlu0 %v4333_v30, %s3606_s3 }
 0x181   :  { %v2503_v8 = vpop.permute.xlu1 %2502  ;;  %v2501_v9 = vpop.permute.xlu0 %2500 }
 0x182   :  { %2574 = vrot.lane.b32.xlu1 %v4320_v21, %s3606_s3  ;;  %v4340_v33 = vmax.f32 %v3736_v13, %v2503_v8  ;;  %v4343_v35 = vmax.f32 %v3727_v12, %v2501_v9 }
 0x184   :  { %4801 = vst [vmem:[#allocation16_spill] sm:$0xff] %v4340_v33  ;;  %4802 = vst [vmem:[#allocation17_spill] sm:$0xff] %v4343_v35  ;;  %2580 = vrot.lane.b32.xlu0 %v4343_v35, %s3606_s3 }
 0x185   :  { %v2507_v10 = vpop.permute.xlu1 %2506  ;;  %v2505_v11 = vpop.permute.xlu0 %2504 }
 0x186   :  { %2578 = vrot.lane.b32.xlu1 %v4330_v29, %s3606_s3  ;;  %v4350_v36 = vmax.f32 %v3750_v15, %v2507_v10  ;;  %v4353_v37 = vmax.f32 %v3741_v14, %v2505_v11 }
 0x188   :  { %4803 = vst [vmem:[#allocation18_spill] sm:$0xff] %v4350_v36  ;;  %4804 = vst [vmem:[#allocation19_spill] sm:$0xff] %v4353_v37  ;;  %2584 = vrot.lane.b32.xlu0 %v4353_v37, %s3606_s3 }
 0x189   :  { %v2511_v12 = vpop.permute.xlu1 %2510  ;;  %v2509_v13 = vpop.permute.xlu0 %2508 }
 0x18a   :  { %2582 = vrot.lane.b32.xlu1 %v4340_v33, %s3606_s3  ;;  %v4360_v39 = vmax.f32 %v3764_v17, %v2511_v12  ;;  %v4363_v40 = vmax.f32 %v3755_v16, %v2509_v13 }
 0x18c   :  { %4805 = vst [vmem:[#allocation20_spill] sm:$0xff] %v4360_v39  ;;  %4806 = vst [vmem:[#allocation21_spill] sm:$0xff] %v4363_v40  ;;  %2588 = vrot.lane.b32.xlu0 %v4363_v40, %s3606_s3 }
 0x18e   :  { %2586 = vrot.lane.b32.xlu1 %v4350_v36, %s3606_s3 }
 0x192   :  { %2590 = vrot.lane.b32.xlu1 %v4360_v39, %s3606_s3 }
 0x1a4   :  { %v3327_v38 = vpop.f32.mrf.mxu0 }
 0x1a6   :  { %v520_v15 = vpop.f32.mrf.mxu0 }
 0x1a8   :  { %v3330_v14 = vpop.f32.mrf.mxu0 }
 0x1aa   :  { %v530_v41 = vpop.f32.mrf.mxu0 }
 0x1ac   :  { %v3333_v44 = vpop.f32.mrf.mxu0 }
 0x1ae   :  { %v540_v45 = vpop.f32.mrf.mxu0 }
 0x1b0   :  { %v3336_v47 = vpop.f32.mrf.mxu1  ;;  %v3379_v48 = vpop.f32.mrf.mxu0 }
 0x1b2   :  { %v550_v49 = vpop.f32.mrf.mxu1  ;;  %v930_v54 = vpop.f32.mrf.mxu0 }
 0x1b4   :  { %v3339_v17 = vpop.f32.mrf.mxu1  ;;  %v3382_v50 = vpop.f32.mrf.mxu0 }
 0x1b6   :  { %v560_v51 = vpop.f32.mrf.mxu1  ;;  %v940_v16 = vpop.f32.mrf.mxu0 }
 0x1b8   :  { %v3342_v52 = vpop.f32.mrf.mxu1  ;;  %v3385_v53 = vpop.f32.mrf.mxu0 }
 0x1ba   :  { %v570_v58 = vpop.f32.mrf.mxu1  ;;  %v950_v60 = vpop.f32.mrf.mxu0 }
 0x1bc   :  { %v3345_v55 = vpop.f32.mrf.mxu1  ;;  %v3388_v56 = vpop.f32.mrf.mxu0 }
 0x1be   :  { %v580_v61 = vpop.f32.mrf.mxu1  ;;  %v960_v18 = vpop.f32.mrf.mxu0 }
 0x1c0   :  { %v3348_v27 = vpop.f32.mrf.mxu1  ;;  %v3391_v31 = vpop.f32.mrf.mxu0 }
 0x1c2   :  { %v4369_v43 = vpop.f32.mrf.mxu1  ;;  %v970_v34 = vpop.f32.mrf.mxu0 }
 0x1c4   :  { %v3353_v46 = vpop.f32.mrf.mxu1  ;;  %v3394_v22 = vpop.f32.mrf.mxu0 }
 0x1c5   :  { %v722_v57 = vadd.f32 %v3353_v46, %v3327_v38 }
 0x1c6   :  { %v716_v1 = vpop.f32.mrf.mxu1  ;;  %v980_v19 = vpop.f32.mrf.mxu0 }
 0x1c7   :  { %v717_v26 = vadd.f32 %v716_v1, %v520_v15  ;;  %v4371_v42 = vadd.f32 %v3379_v48, %v722_v57 }
 0x1c8   :  { %v3356_v23 = vpop.f32.mrf.mxu1  ;;  %v3397_v63 = vpop.f32.mrf.mxu0 }
 0x1c9   :  { %v732_v25 = vadd.f32 %v3356_v23, %v3330_v14  ;;  %v4373_v0 = vadd.f32 %v930_v54, %v717_v26 }
 0x1ca   :  { %v726_v20 = vpop.f32.mrf.mxu1  ;;  %v990_v5 = vpop.f32.mrf.mxu0 }
 0x1cb   :  { %v727_v7 = vadd.f32 %v726_v20, %v530_v41  ;;  %v4375_v24 = vadd.f32 %v3382_v50, %v732_v25 }
 0x1cc   :  { %v3359_v28 = vpop.f32.mrf.mxu1  ;;  %v3400_v8 = vpop.f32.mrf.mxu0 }
 0x1cd   :  { %v742_v9 = vadd.f32 %v3359_v28, %v3333_v44  ;;  %v4377_v10 = vadd.f32 %v940_v16, %v727_v7 }
 0x1ce   :  { %v736_v11 = vpop.f32.mrf.mxu1  ;;  %v1000_v12 = vpop.f32.mrf.mxu0 }
 0x1cf   :  { %v737_v13 = vadd.f32 %v736_v11, %v540_v45  ;;  %v4379_v38 = vadd.f32 %v3385_v53, %v742_v9 }
 0x1d0   :  { %v3362_v15 = vpop.f32.mrf.mxu1  ;;  %v4381_v48 = vpop.f32.mrf.mxu0 }
 0x1d1   :  { %v752_v14 = vadd.f32 %v3362_v15, %v3336_v47  ;;  %v4383_v54 = vadd.f32 %v950_v60, %v737_v13 }
 0x1d2   :  { %v746_v46 = vpop.f32.mrf.mxu1  ;;  %v4385_v41 = vpop.f32.mrf.mxu0 }
 0x1d3   :  { %v747_v50 = vadd.f32 %v746_v46, %v550_v49  ;;  %v4387_v57 = vadd.f32 %v3388_v56, %v752_v14 }
 0x1d4   :  { %v3365_v44 = vpop.f32.mrf.mxu1  ;;  %v4389_v16 = vpop.f32.mrf.mxu0 }
 0x1d5   :  { %v762_v1 = vadd.f32 %v3365_v44, %v3339_v17  ;;  %v4391_v26 = vadd.f32 %v960_v18, %v747_v50 }
 0x1d6   :  { %v756_v45 = vpop.f32.mrf.mxu1  ;;  %v4393_v53 = vpop.f32.mrf.mxu0 }
 0x1d7   :  { %v757_v23 = vadd.f32 %v756_v45, %v560_v51  ;;  %v4395_v25 = vadd.f32 %v3391_v31, %v762_v1 }
 0x1d8   :  { %v3368_v47 = vpop.f32.mrf.mxu1  ;;  %v4397_v60 = vpop.f32.mrf.mxu0 }
 0x1d9   :  { %v772_v20 = vadd.f32 %v3368_v47, %v3342_v52  ;;  %v4399_v7 = vadd.f32 %v970_v34, %v757_v23 }
 0x1da   :  { %v766_v49 = vpop.f32.mrf.mxu1  ;;  %v4401_v56 = vpop.f32.mrf.mxu0 }
 0x1db   :  { %v767_v28 = vadd.f32 %v766_v49, %v570_v58  ;;  %v4403_v9 = vadd.f32 %v3394_v22, %v772_v20 }
 0x1dc   :  { %v3371_v17 = vpop.f32.mrf.mxu1  ;;  %v4405_v18 = vpop.f32.mrf.mxu0 }
 0x1dd   :  { %v782_v11 = vadd.f32 %v3371_v17, %v3345_v55  ;;  %v4407_v13 = vadd.f32 %v980_v19, %v767_v28 }
 0x1de   :  { %v776_v51 = vpop.f32.mrf.mxu1  ;;  %v4409_v31 = vpop.f32.mrf.mxu0 }
 0x1df   :  { %v777_v15 = vadd.f32 %v776_v51, %v580_v61  ;;  %v4411_v14 = vadd.f32 %v3397_v63, %v782_v11 }
 0x1e0   :  { %v3374_v52 = vpop.f32.mrf.mxu1  ;;  %v4413_v34 = vpop.f32.mrf.mxu0 }
 0x1e1   :  { %v792_v46 = vadd.f32 %v3374_v52, %v3348_v27  ;;  %v4415_v50 = vadd.f32 %v990_v5, %v777_v15 }
 0x1e2   :  { %v786_v58 = vpop.f32.mrf.mxu1  ;;  %v4417_v22 = vpop.f32.mrf.mxu0 }
 0x1e3   :  { %v787_v44 = vadd.f32 %v786_v58, %v4369_v43  ;;  %v4420_v55 = vadd.f32 %v3400_v8, %v792_v46 }
 0x1e4   :  { %v3405_v19 = vpop.f32.mrf.mxu1  ;;  %v4422_v1 = vpop.f32.mrf.mxu0 }
 0x1e5   :  { %v4424_v45 = vadd.f32 %v1000_v12, %v787_v44 }
 0x1e6   :  { %v1160_v61 = vpop.f32.mrf.mxu1  ;;  %v4426_v63 = vpop.f32.mrf.mxu0 }
 0x1e7   :  { %4807 = vst [vmem:[#allocation22_spill] sm:$0xff] %v4424_v45 }
 0x1e8   :  { %v3408_v23 = vpop.f32.mrf.mxu1  ;;  %v4428_v47 = vpop.f32.mrf.mxu0 }
 0x1ea   :  { %v1170_v27 = vpop.f32.mrf.mxu1  ;;  %v4430_v5 = vpop.f32.mrf.mxu0 }
 0x1ec   :  { %v3411_v20 = vpop.f32.mrf.mxu1  ;;  %v4432_v49 = vpop.f32.mrf.mxu0 }
 0x1ed   :  { %4808 = vst [vmem:[#allocation23_spill] sm:$0xff] %v4432_v49 }
 0x1ee   :  { %v1180_v43 = vpop.f32.mrf.mxu1  ;;  %v4434_v8 = vpop.f32.mrf.mxu0 }
 0x1ef   :  { %4809 = vst [vmem:[#allocation24_spill] sm:$0xff] %v4434_v8 }
 0x1f0   :  { %v3414_v28 = vpop.f32.mrf.mxu1  ;;  %v4436_v17 = vpop.f32.mrf.mxu0 }
 0x1f2   :  { %v1190_v12 = vpop.f32.mrf.mxu1  ;;  %v4438_v11 = vpop.f32.mrf.mxu0 }
 0x1f4   :  { %v3417_v51 = vpop.f32.mrf.mxu1  ;;  %v4440_v15 = vpop.f32.mrf.mxu0 }
 0x1f6   :  { %v1200_v52 = vpop.f32.mrf.mxu1  ;;  %v4442_v46 = vpop.f32.mrf.mxu0 }
 0x1f7   :  { %4810 = vst [vmem:[#allocation25_spill] sm:$0xff] %v4442_v46 }
 0x1f8   :  { %v4444_v58 = vpop.f32.mrf.mxu1  ;;  %v4446_v44 = vpop.f32.mrf.mxu0 }
 0x1f9   :  { %4811 = vst [vmem:[#allocation26_spill] sm:$0xff] %v4446_v44 }
 0x1fa   :  { %v4448_v40 = vpop.f32.mrf.mxu1  ;;  %v4450_v39 = vpop.f32.mrf.mxu0 }
 0x1fb   :  { %4812 = vst [vmem:[#allocation27_spill] sm:$0xff] %v4450_v39 }
 0x1fc   :  { %v3423_v37 = vpop.f32.mrf.mxu1  ;;  %v4452_v36 = vpop.f32.mrf.mxu0 }
 0x1fd   :  { %4813 = vst [vmem:[#allocation28_spill] sm:$0xff] %v4452_v36 }
 0x1fe   :  { %v1220_v35 = vpop.f32.mrf.mxu1  ;;  %v4454_v33 = vpop.f32.mrf.mxu0 }
 0x1ff   :  { %4814 = vst [vmem:[#allocation29_spill] sm:$0xff] %v4454_v33 }
 0x200   :  { %v4456_v30 = vpop.f32.mrf.mxu1  ;;  %v4458_v29 = vpop.f32.mrf.mxu0 }
 0x201   :  { %4815 = vst [vmem:[#allocation30_spill] sm:$0xff] %v4458_v29 }
 0x202   :  { %v4460_v6 = vpop.f32.mrf.mxu1  ;;  %v4462_v21 = vpop.f32.mrf.mxu0 }
 0x203   :  { %4816 = vst [vmem:[#allocation31_spill] sm:$0xff] %v4460_v6  ;;  %4817 = vst [vmem:[#allocation32_spill] sm:$0xff] %v4462_v21 }
 0x204   :  { %v3457_v3 = vpop.f32.mrf.mxu1  ;;  %v4464_v4 = vpop.f32.mrf.mxu0 }
 0x205   :  { %4818 = vst [vmem:[#allocation33_spill] sm:$0xff] %v4464_v4 }
 0x206   :  { %v1620_v59 = vpop.f32.mrf.mxu1  ;;  %v4466_v2 = vpop.f32.mrf.mxu0 }
 0x207   :  { %4819 = vst [vmem:[#allocation34_spill] sm:$0xff] %v4466_v2 }
 0x208   :  { %v3460_v32 = vpop.f32.mrf.mxu1  ;;  %v4468_v62 = vpop.f32.mrf.mxu0 }
 0x209   :  { %4820 = vst [vmem:[#allocation35_spill] sm:$0xff] %v4468_v62 }
 0x20a   :  { %v1630_v36 = vpop.f32.mrf.mxu1  ;;  %v4470_v8 = vpop.f32.mrf.mxu0 }
 0x20b   :  { %4821 = vst [vmem:[#allocation36_spill] sm:$0xff] %v4470_v8 }
 0x20c   :  { %v3463_v33 = vpop.f32.mrf.mxu1  ;;  %v4472_v39 = vpop.f32.mrf.mxu0 }
 0x20d   :  { %4822 = vst [vmem:[#allocation37_spill] sm:$0xff] %v4472_v39  ;;  %v1240_v39 = vadd.f32 %v3405_v19, %v4371_v42  ;;  %v1243_v19 = vadd.f32 %v1180_v43, %v4383_v54  ;;  %v4835_v43 = vld [vmem:[#allocation31_spill] sm:$0xff] }
 0x20e   :  { %v1640_v29 = vpop.f32.mrf.mxu1  ;;  %v4474_v44 = vpop.f32.mrf.mxu0 }
 0x20f   :  { %4823 = vst [vmem:[#allocation38_spill] sm:$0xff] %v4474_v44 }
 0x210   :  { %v4476_v46 = vpop.f32.mrf.mxu1  ;;  %v3535_v21 = vpop.f32.mrf.mxu0 }
 0x211   :  { %4824 = vst [vmem:[#allocation39_spill] sm:$0xff] %v4476_v46 }
 0x212   :  { %v4478_v49 = vpop.f32.mrf.mxu1  ;;  %v4480_v4 = vpop.f32.mrf.mxu0 }
 0x213   :  { %4825 = vst [vmem:[#allocation40_spill] sm:$0xff] %v4478_v49  ;;  %4826 = vst [vmem:[#allocation41_spill] sm:$0xff] %v4480_v4  ;;  %v1239_v49 = vadd.f32 %v1160_v61, %v4373_v0 }
 0x214   :  { %v4482_v2 = vpop.f32.mrf.mxu1  ;;  %v4484_v6 = vpop.f32.mrf.mxu0 }
 0x215   :  { %4827 = vst [vmem:[#allocation42_spill] sm:$0xff] %v4482_v2  ;;  %4828 = vst [vmem:[#allocation43_spill] sm:$0xff] %v4484_v6  ;;  %v1242_v2 = vadd.f32 %v3408_v23, %v4375_v24  ;;  %v1470_v6 = vadd.f32 %v4381_v48, %v1240_v39  ;;  %v1469_v0 = vadd.f32 %v4385_v41, %v1239_v49 }
 0x216   :  { %v4486_v62 = vpop.f32.mrf.mxu1  ;;  %v4488_v8 = vpop.f32.mrf.mxu0  ;;  %v1245_v24 = vadd.f32 %v1190_v12, %v4391_v26  ;;  %v1248_v39 = vadd.f32 %v3417_v51, %v4395_v25  ;;  %v1247_v48 = vadd.f32 %v1200_v52, %v4399_v7  ;;  %v4840_v52 = vld [vmem:[#allocation26_spill] sm:$0xff] }
 0x217   :  { %4829 = vst [vmem:[#allocation44_spill] sm:$0xff] %v4486_v62  ;;  %4830 = vst [vmem:[#allocation45_spill] sm:$0xff] %v4488_v8  ;;  %v1241_v62 = vadd.f32 %v1170_v27, %v4377_v10  ;;  %v1244_v8 = vadd.f32 %v3411_v20, %v4379_v38  ;;  %v1699_v10 = vadd.f32 %v1620_v59, %v1469_v0 }
 0x218   :  { %v4490_v45 = vpop.f32.mrf.mxu1  ;;  %v4493_v44 = vpop.f32.mrf.mxu0  ;;  %v1472_v38 = vadd.f32 %v4389_v16, %v1242_v2  ;;  %v1250_v2 = vadd.f32 %v4444_v58, %v4403_v9  ;;  %v1252_v16 = vadd.f32 %v3423_v37, %v4411_v14  ;;  %v1477_v49 = vadd.f32 %v4417_v22, %v1247_v48  ;;  %v4837_v12 = vld [vmem:[#allocation39_spill] sm:$0xff] }
 0x219   :  { %4831 = vst [vmem:[#allocation46_spill] sm:$0xff] %v4490_v45  ;;  %4832 = vst [vmem:[#allocation47_spill] sm:$0xff] %v4493_v44  ;;  %v1700_v44 = vadd.f32 %v3457_v3, %v1470_v6  ;;  %v1471_v23 = vadd.f32 %v4393_v53, %v1241_v62  ;;  %v1474_v54 = vadd.f32 %v4397_v60, %v1244_v8  ;;  %v4523_v6 = vstv %s3088_s5 }
 0x21a   :  { %v4495_v46 = vpop.f32.mrf.mxu1  ;;  %v4504_v45 = vpop.f32.mrf.mxu0  ;;  %v1702_v41 = vadd.f32 %v3460_v32, %v1472_v38  ;;  %v1249_v62 = vadd.f32 %v4448_v40, %v4407_v13  ;;  %v1251_v53 = vadd.f32 %v1220_v35, %v4415_v50  ;;  %v1475_v60 = vadd.f32 %v4409_v31, %v1245_v24  ;;  %v4545_v35 = vld [vmem:[%s4771_s4] ss:$0 sm:$0xff]  ;;  %v4841_v58 = vld [vmem:[#allocation40_spill] sm:$0xff]  ;;  %s3106_s4 = sld [smem:[#allocation3 + $0x2]] }
 0x21b   :  { %4833 = vst [vmem:[#allocation48_spill] sm:$0xff] %v4495_v46  ;;  %v1246_v46 = vadd.f32 %v3414_v28, %v4387_v57  ;;  %v1473_v57 = vadd.f32 %v4401_v56, %v1243_v19  ;;  %v1931_v59 = vadd.f32 %v4436_v17, %v1700_v44  ;;  %v1478_v32 = vadd.f32 %v4413_v34, %v1248_v39  ;;  %v4843_v39 = vld [vmem:[#allocation27_spill] sm:$0xff] }
 0x21c   :  { %v4498_v4 = vpop.f32.mrf.mxu1  ;;  %v4519_v27 = vpop.f32.mrf.mxu0  ;;  %v1930_v56 = vadd.f32 %v4438_v11, %v1699_v10  ;;  %v1701_v20 = vadd.f32 %v1630_v36, %v1471_v23  ;;  %v1704_v9 = vadd.f32 %v3463_v33, %v1474_v54  ;;  %v1933_v34 = vadd.f32 %v4440_v15, %v1702_v41  ;;  %v4842_v0 = vld [vmem:[#allocation43_spill] sm:$0xff]  ;;  %v4844_v38 = vld [vmem:[#allocation42_spill] sm:$0xff] }
 0x21d   :  { %v1476_v26 = vadd.f32 %v4405_v18, %v1246_v46  ;;  %v1254_v18 = vadd.f32 %v4456_v30, %v4420_v55  ;;  %v1703_v13 = vadd.f32 %v1640_v29, %v1473_v57  ;;  %v1480_v50 = vadd.f32 %v4422_v1, %v1250_v2  ;;  %v4834_v55 = vld [vmem:[#allocation22_spill] sm:$0xff]  ;;  %v4838_v1 = vld [vmem:[#allocation23_spill] sm:$0xff] }
 0x21e   :  { %v4506_v42 = vpop.f32.mrf.mxu1  ;;  %v4540_v40 = vpop.f32.mrf.mxu0  ;;  %v1479_v30 = vadd.f32 %v4426_v63, %v1249_v62  ;;  %v4551_v33 = vadd.f32 %v4428_v47, %v1252_v16  ;;  %v4554_v36 = vadd.f32 %v4430_v5, %v1251_v53  ;;  %v1253_v8 = vadd.f32 %v4835_v43, %v4834_v55  ;;  %v4839_v47 = vld [vmem:[#allocation25_spill] sm:$0xff]  ;;  %v4845_v2 = vld [vmem:[#allocation44_spill] sm:$0xff]  ;;  %v4851_v55 = vld [vmem:[#allocation30_spill] sm:$0xff] }
 0x21f   :  { %v1706_v11 = vadd.f32 %v4837_v12, %v1476_v26  ;;  %v4562_v51 = vadd.f32 %v4838_v1, %v1254_v18  ;;  %v1932_v15 = vadd.f32 %v4839_v47, %v1701_v20  ;;  %v1935_v46 = vadd.f32 %v4840_v52, %v1704_v9  ;;  %v4846_v16 = vld [vmem:[#allocation24_spill] sm:$0xff] }
 0x220   :  { %v4511_v61 = vpop.f32.mrf.mxu1  ;;  %v4564_v63 = vpop.f32.mrf.mxu0  ;;  %v1705_v44 = vadd.f32 %v4841_v58, %v1475_v60  ;;  %v1934_v10 = vadd.f32 %v4843_v39, %v1703_v13  ;;  %v1708_v48 = vadd.f32 %v4844_v38, %v1478_v32  ;;  %v1707_v62 = vadd.f32 %v4845_v2, %v1477_v49  ;;  %v4847_v60 = vld [vmem:[#allocation45_spill] sm:$0xff]  ;;  %v4849_v20 = vld [vmem:[#allocation47_spill] sm:$0xff]  ;;  %v4852_v12 = vld [vmem:[#allocation46_spill] sm:$0xff] }
 0x221   :  { %v4578_v53 = vadd.f32 %v4846_v16, %v1253_v8  ;;  %v4856_v2 = vld [vmem:[#allocation34_spill] sm:$0xff] }
 0x222   :  { %v4521_v3 = vpop.f32.mrf.mxu1  ;;  %v1939_v43 = vadd.f32 %v4851_v55, %v1708_v48  ;;  %v4854_v52 = vld [vmem:[#allocation48_spill] sm:$0xff] }
 0x224   :  { %v3509_v25 = vpop.f32.mrf.mxu1 }
 0x225   :  { %v2161_v7 = vadd.f32 %v3509_v25, %v1931_v59  ;;  %v2351_v25 = vpop.f32.mrf.mxu0 }
 0x226   :  { %v2081_v37 = vpop.f32.mrf.mxu1 }
 0x227   :  { %v2391_v31 = vadd.f32 %v3535_v21, %v2161_v7  ;;  %v2160_v14 = vadd.f32 %v2081_v37, %v1930_v56  ;;  %v4836_v21 = vld [vmem:[#allocation41_spill] sm:$0xff]  ;;  %v4848_v56 = vld [vmem:[#allocation28_spill] sm:$0xff]  ;;  %v3550_v1 = vpop.f32.mrf.mxu0 }
 0x228   :  { %v3512_v22 = vpop.f32.mrf.mxu1  ;;  %v1937_v18 = vadd.f32 %v4848_v56, %v1706_v11  ;;  %v1710_v11 = vadd.f32 %v4852_v12, %v1480_v50 }
 0x229   :  { %v2414_v29 = vadd.f32 %v4545_v35, %v2391_v31  ;;  %v2390_v28 = vadd.f32 %v4836_v21, %v2160_v14  ;;  %v2163_v17 = vadd.f32 %v3512_v22, %v1933_v34  ;;  %v4850_v31 = vld [vmem:[#allocation29_spill] sm:$0xff]  ;;  %v2361_v48 = vpop.f32.mrf.mxu0 }
 0x22a   :  { %v2091_v5 = vpop.f32.mrf.mxu1  ;;  %v1936_v14 = vadd.f32 %v4850_v31, %v1705_v44 }
 0x22b   :  { %v2413_v19 = vadd.f32 %v4545_v35, %v2390_v28  ;;  %v2393_v24 = vadd.f32 %v4842_v0, %v2163_v17  ;;  %vm2431_vm3 = vcmp.gt.f32.partialorder %v2414_v29, 0.0  ;;  %v2448_v23 = vmul.f32 %v4523_v6, %v2414_v29 }
 0x22c   :  { %v2162_v54 = vadd.f32 %v2091_v5, %v1932_v15  ;;  %v3515_v41 = vpop.f32.mrf.mxu1 }
 0x22d   :  { %v2416_v57 = vadd.f32 %v4545_v35, %v2393_v24  ;;  %v2165_v26 = vadd.f32 %v3515_v41, %v1935_v46  ;;  %vm2430_vm6 = vcmp.gt.f32.partialorder %v2413_v19, 0.0  ;;  %v2447_v59 = vmul.f32 %v4523_v6, %v2413_v19 }
 0x22e   :  { %v2392_v7 = vadd.f32 %v4847_v60, %v2162_v54  ;;  %v2101_v32 = vpop.f32.mrf.mxu1  ;;  %v2464_v49 = vsel %vm2431_vm3, %v2414_v29, %v2448_v23  ;;  %v4853_v29 = vld [vmem:[#allocation32_spill] sm:$0xff]  ;;  %v1709_v46 = vadd.f32 %v4854_v52, %v1479_v30  ;;  %v1712_v30 = vadd.f32 %v4498_v4, %v4551_v33  ;;  %v4855_v54 = vld [vmem:[#allocation33_spill] sm:$0xff] }
 0x22f   :  { %v2395_v9 = vadd.f32 %v4849_v20, %v2165_v26  ;;  %v2164_v37 = vadd.f32 %v2101_v32, %v1934_v10  ;;  %v2463_v13 = vsel %vm2430_vm6, %v2413_v19, %v2447_v59  ;;  %v2450_v8 = vmul.f32 %v4523_v6, %v2416_v57  ;;  %v3553_v32 = vpop.f32.mrf.mxu0 }
 0x230   :  { %v2415_v34 = vadd.f32 %v4545_v35, %v2392_v7  ;;  %v3518_v22 = vpop.f32.mrf.mxu1  ;;  %3559 = vmatprep.mubr.msk.f32.mxu1 %vm308_vm1, %v2463_v13  ;;  %vm2433_vm7 = vcmp.gt.f32.partialorder %v2416_v57, 0.0  ;;  %v1938_v5 = vadd.f32 %v4853_v29, %v1707_v62  ;;  %v1941_v41 = vadd.f32 %v4855_v54, %v1710_v11 }
 0x231   :  { %v2418_v21 = vadd.f32 %v4545_v35, %v2395_v9  ;;  %v2394_v28 = vadd.f32 %v4504_v45, %v2164_v37  ;;  %v2167_v17 = vadd.f32 %v3518_v22, %v1937_v18  ;;  %3560 = vmatmul.mubr.msk.f32.vlgmr.msra.gmra.mxu1 %vm308_vm1, %v2464_v49  ;;  %v2466_v24 = vsel %vm2433_vm7, %v2416_v57, %v2450_v8  ;;  %v4857_v18 = vld [vmem:[#allocation35_spill] sm:$0xff]  ;;  %v4858_v37 = vld [vmem:[#allocation36_spill] sm:$0xff] }
 0x232   :  { %v2111_v47 = vpop.f32.mrf.mxu1  ;;  %vm2432_vm8 = vcmp.gt.f32.partialorder %v2415_v34, 0.0  ;;  %v2449_v15 = vmul.f32 %v4523_v6, %v2415_v34  ;;  %v1940_v62 = vadd.f32 %v4856_v2, %v1709_v46  ;;  %v1943_v20 = vadd.f32 %v4857_v18, %v1712_v30  ;;  %v4863_v18 = vld [vmem:[#allocation9_spill] sm:$0xff] }
 0x233   :  { %v2417_v58 = vadd.f32 %v4545_v35, %v2394_v28  ;;  %v2397_v44 = vadd.f32 %v4519_v27, %v2167_v17  ;;  %v2166_v45 = vadd.f32 %v2111_v47, %v1936_v14  ;;  %vm2435_vm9 = vcmp.gt.f32.partialorder %v2418_v21, 0.0  ;;  %v4860_v47 = vld [vmem:[#allocation38_spill] sm:$0xff] }
 0x234   :  { %v3521_v19 = vpop.f32.mrf.mxu1  ;;  %v2465_v0 = vsel %vm2432_vm8, %v2415_v34, %v2449_v15  ;;  %v2452_v50 = vmul.f32 %v4523_v6, %v2418_v21  ;;  %v1711_v27 = vadd.f32 %v4506_v42, %v4554_v36  ;;  %vm2624_vm6 = vcmask 31744  }
 0x235   :  { %v2420_v39 = vadd.f32 %v4545_v35, %v2397_v44  ;;  %v2396_v10 = vadd.f32 %v4540_v40, %v2166_v45  ;;  %v2169_v38 = vadd.f32 %v3521_v19, %v1939_v43  ;;  %3562 = vmatprep.mubr.msk.f32.mxu1 %vm308_vm1, %v2465_v0  ;;  %vm2434_vm10 = vcmp.gt.f32.partialorder %v2417_v58, 0.0 }
 0x236   :  { %3563 = vmatmul.mubr.msk.f32.gmra.mxu1 %vm308_vm1, %v2466_v24  ;;  %v2121_v23 = vpop.f32.mrf.mxu1  ;;  %v2451_v57 = vmul.f32 %v4523_v6, %v2417_v58  ;;  %v2468_v33 = vsel %vm2435_vm9, %v2418_v21, %v2452_v50  ;;  %v1942_v13 = vadd.f32 %v4858_v37, %v1711_v27  ;;  %v2371_v21 = vpop.f32.mrf.mxu0  ;;  %vm2887_vm7 = vcmask 64512  }
 0x237   :  { %v2419_v40 = vadd.f32 %v4545_v35, %v2396_v10  ;;  %v2399_v26 = vadd.f32 %v4564_v63, %v2169_v38  ;;  %v2168_v59 = vadd.f32 %v2121_v23, %v1938_v5  ;;  %vm2437_vm11 = vcmp.gt.f32.partialorder %v2420_v39, 0.0 }
 0x238   :  { %v3524_v16 = vpop.f32.mrf.mxu1  ;;  %v2467_v4 = vsel %vm2434_vm10, %v2417_v58, %v2451_v57  ;;  %v2454_v42 = vmul.f32 %v4523_v6, %v2420_v39  ;;  %v1714_v63 = vadd.f32 %v4511_v61, %v4562_v51  ;;  %v3556_v5 = vpop.f32.mrf.mxu0 }
 0x239   :  { %v2422_v36 = vadd.f32 %v4545_v35, %v2399_v26  ;;  %v2398_v60 = vadd.f32 %v2351_v25, %v2168_v59  ;;  %v2171_v7 = vadd.f32 %v3524_v16, %v1941_v41  ;;  %3565 = vmatprep.mubr.msk.f32.mxu1 %vm308_vm1, %v2467_v4  ;;  %vm2436_vm12 = vcmp.gt.f32.partialorder %v2419_v40, 0.0  ;;  %v2563_v4 = vpop.permute.xlu1 %2562 }
 0x23a   :  { %3566 = vmatmul.mubr.msk.f32.gmra.mxu1 %vm308_vm1, %v2468_v33  ;;  %v2131_v56 = vpop.f32.mrf.mxu1  ;;  %v2453_v9 = vmul.f32 %v4523_v6, %v2419_v40  ;;  %v1713_v25 = vadd.f32 %v4521_v3, %v4578_v53  ;;  %v2470_v61 = vsel %vm2437_vm11, %v2420_v39, %v2454_v42  ;;  %v4859_v53 = vld [vmem:[#allocation37_spill] sm:$0xff]  ;;  %v2381_v38 = vpop.f32.mrf.mxu0 }
 0x23b   :  { %v2421_v31 = vadd.f32 %v4545_v35, %v2398_v60  ;;  %v2401_v14 = vadd.f32 %v3550_v1, %v2171_v7  ;;  %v2170_v34 = vadd.f32 %v2131_v56, %v1940_v62  ;;  %vm2439_vm13 = vcmp.gt.f32.partialorder %v2422_v36, 0.0  ;;  %v4861_v7 = vld [vmem:[#allocation8_spill] sm:$0xff] }
 0x23c   :  { %v3527_v22 = vpop.f32.mrf.mxu1  ;;  %v2469_v49 = vsel %vm2436_vm12, %v2419_v40, %v2453_v9  ;;  %v2456_v51 = vmul.f32 %v4523_v6, %v2422_v36  ;;  %v1945_v28 = vadd.f32 %v4859_v53, %v1714_v63  ;;  %v1944_v15 = vadd.f32 %v4860_v47, %v1713_v25  ;;  %v4862_v63 = vld [vmem:[#allocation6_spill] sm:$0xff] }
 0x23d   :  { %v2424_v55 = vadd.f32 %v4545_v35, %v2401_v14  ;;  %v2400_v43 = vadd.f32 %v2361_v48, %v2170_v34  ;;  %v2173_v8 = vadd.f32 %v3527_v22, %v1943_v20  ;;  %3568 = vmatprep.mubr.msk.f32.mxu1 %vm308_vm1, %v2469_v49  ;;  %vm2438_vm14 = vcmp.gt.f32.partialorder %v2421_v31, 0.0  ;;  %v2567_v33 = vpop.permute.xlu1 %2566  ;;  %v4864_v14 = vld [vmem:[#allocation7_spill] sm:$0xff] }
 0x23e   :  { %3569 = vmatmul.mubr.msk.f32.gmra.mxu1 %vm308_vm1, %v2470_v61  ;;  %v2141_v3 = vpop.f32.mrf.mxu1  ;;  %v2455_v17 = vmul.f32 %v4523_v6, %v2421_v31  ;;  %v2472_v46 = vsel %vm2439_vm13, %v2422_v36, %v2456_v51  ;;  %v2611_v20 = vmax.f32 %v4863_v18, %v2567_v33  ;;  %v4657_v25 = vstv %s3106_s4 }
 0x23f   :  { %v2423_v12 = vadd.f32 %v4545_v35, %v2400_v43  ;;  %v2403_v11 = vadd.f32 %v3553_v32, %v2173_v8  ;;  %v2172_v1 = vadd.f32 %v2141_v3, %v1942_v13  ;;  %vm2441_vm15 = vcmp.gt.f32.partialorder %v2424_v55, 0.0  ;;  %v4865_v8 = vld [vmem:[#allocation10_spill] sm:$0xff] }
 0x240   :  { %v3530_v29 = vpop.f32.mrf.mxu1  ;;  %v2471_v52 = vsel %vm2438_vm14, %v2421_v31, %v2455_v17  ;;  %v2458_v58 = vmul.f32 %v4523_v6, %v2424_v55  ;;  %v2628_v43 = vsel %vm2624_vm6, %v2611_v20, 0.0 }
 0x241   :  { %v2426_v44 = vadd.f32 %v4545_v35, %v2403_v11  ;;  %v2402_v45 = vadd.f32 %v2371_v21, %v2172_v1  ;;  %v2175_v19 = vadd.f32 %v3530_v29, %v1945_v28  ;;  %3571 = vmatprep.mubr.msk.f32.mxu1 %vm308_vm1, %v2471_v52  ;;  %vm2440_vm0 = vcmp.gt.f32.partialorder %v2423_v12, 0.0  ;;  %v2571_v36 = vpop.permute.xlu1 %2570  ;;  %v4866_v11 = vld [vmem:[#allocation11_spill] sm:$0xff] }
 0x242   :  { %3572 = vmatmul.mubr.msk.f32.gmra.mxu1 %vm308_vm1, %v2472_v46  ;;  %v2151_v0 = vpop.f32.mrf.mxu1  ;;  %v2457_v24 = vmul.f32 %v4523_v6, %v2423_v12  ;;  %v2474_v27 = vsel %vm2441_vm15, %v2424_v55, %v2458_v58  ;;  %v2613_v21 = vmax.f32 %v4865_v8, %v2571_v36  ;;  %v4867_v46 = vld [vmem:[#allocation12_spill] sm:$0xff] }
 0x243   :  { %v2425_v50 = vadd.f32 %v4545_v35, %v2402_v45  ;;  %v2405_v39 = vadd.f32 %v3556_v5, %v2175_v19  ;;  %v2174_v10 = vadd.f32 %v2151_v0, %v1944_v15  ;;  %v2460_v48 = vmul.f32 %v4523_v6, %v2426_v44 }
 0x244   :  { %v2473_v30 = vsel %vm2440_vm0, %v2423_v12, %v2457_v24  ;;  %vm2443_vm4 = vcmp.gt.f32.partialorder %v2426_v44, 0.0 }
 0x245   :  { %v2428_v23 = vadd.f32 %v4545_v35, %v2405_v39  ;;  %v2404_v54 = vadd.f32 %v2381_v38, %v2174_v10  ;;  %3574 = vmatprep.mubr.msk.f32.mxu1 %vm308_vm1, %v2473_v30  ;;  %vm2442_vm2 = vcmp.gt.f32.partialorder %v2425_v50, 0.0  ;;  %v2459_v41 = vmul.f32 %v4523_v6, %v2425_v50  ;;  %v2575_v56 = vpop.permute.xlu1 %2574  ;;  %v4868_v39 = vld [vmem:[#allocation13_spill] sm:$0xff] }
 0x246   :  { %3575 = vmatmul.mubr.msk.f32.gmra.mxu1 %vm308_vm1, %v2474_v27  ;;  %v2476_v2 = vsel %vm2443_vm4, %v2426_v44, %v2460_v48  ;;  %v2615_v58 = vmax.f32 %v4867_v46, %v2575_v56  ;;  %v2630_v44 = vsel %vm2624_vm6, %v2613_v21, 0.0 }
 0x247   :  { %v2427_v57 = vadd.f32 %v4545_v35, %v2404_v54  ;;  %v2475_v40 = vsel %vm2442_vm2, %v2425_v50, %v2459_v41  ;;  %v2462_v26 = vmul.f32 %v4523_v6, %v2428_v23  ;;  %vm2445_vm3 = vcmp.gt.f32.partialorder %v2428_v23, 0.0  ;;  %v2561_v35 = vpop.permute.xlu0 %2560  ;;  %v4869_v41 = vld [vmem:[#allocation14_spill] sm:$0xff] }
 0x248   :  { %3577 = vmatprep.mubr.msk.f32.mxu1 %vm308_vm1, %v2475_v40  ;;  %v2608_v32 = vmax.f32 %v4862_v63, %v2561_v35  ;;  %v2632_v40 = vsel %vm2624_vm6, %v2615_v58, 0.0 }
 0x249   :  { %v2461_v59 = vmul.f32 %v4523_v6, %v2427_v57  ;;  %vm2444_vm5 = vcmp.gt.f32.partialorder %v2427_v57, 0.0  ;;  %v2478_v16 = vsel %vm2445_vm3, %v2428_v23, %v2462_v26  ;;  %v2609_v6 = vmax.f32 %v4861_v7, %v2563_v4  ;;  %v2579_v55 = vpop.permute.xlu1 %2578 }
 0x24a   :  { %3578 = vmatmul.mubr.msk.f32.gmra.mxu1 %vm308_vm1, %v2476_v2  ;;  %v2625_v22 = vsel %vm2624_vm6, %v2608_v32, 0.0 }
 0x24b   :  { %v2477_v62 = vsel %vm2444_vm5, %v2427_v57, %v2461_v59  ;;  %v2565_v42 = vpop.permute.xlu0 %2564  ;;  %v2626_v37 = vsel %vm2624_vm6, %v2609_v6, 0.0  ;;  %v2617_v57 = vmax.f32 %v4869_v41, %v2579_v55  ;;  %v4871_v6 = vld [vmem:[#allocation16_spill] sm:$0xff] }
 0x24c   :  { %3580 = vmatprep.mubr.msk.f32.mxu1 %vm308_vm1, %v2477_v62  ;;  %v2610_v34 = vmax.f32 %v4864_v14, %v2565_v42 }
 0x24d   :  { %v2583_v19 = vpop.permute.xlu1 %2582  ;;  %v2634_v32 = vsel %vm2624_vm6, %v2617_v57, 0.0 }
 0x24e   :  { %3581 = vmatmul.mubr.msk.f32.gmra.mxu1 %vm308_vm1, %v2478_v16  ;;  %v2627_v15 = vsel %vm2624_vm6, %v2610_v34, 0.0  ;;  %v4870_v16 = vld [vmem:[#allocation15_spill] sm:$0xff]  ;;  %v2619_v63 = vmax.f32 %v4871_v6, %v2583_v19 }
 0x24f   :  { %v2569_v60 = vpop.permute.xlu0 %2568 }
 0x250   :  { %v2612_v1 = vmax.f32 %v4866_v11, %v2569_v60 }
 0x251   :  { %v2587_v42 = vpop.permute.xlu1 %2586 }
 0x252   :  { %v2629_v38 = vsel %vm2624_vm6, %v2612_v1, 0.0 }
 0x253   :  { %v2573_v9 = vpop.permute.xlu0 %2572 }
 0x254   :  { %v2614_v10 = vmax.f32 %v4868_v39, %v2573_v9 }
 0x255   :  { %v2591_v21 = vpop.permute.xlu1 %2590 }
 0x256   :  { %v2631_v35 = vsel %vm2624_vm6, %v2614_v10, 0.0 }
 0x257   :  { %v2577_v17 = vpop.permute.xlu0 %2576 }
 0x258   :  { %v2616_v4 = vmax.f32 %v4870_v16, %v2577_v17  ;;  %v4874_v17 = vld [vmem:[#allocation19_spill] sm:$0xff] }
 0x25a   :  { %v2633_v14 = vsel %vm2624_vm6, %v2616_v4, 0.0 }
 0x25b   :  { %v2581_v27 = vpop.permute.xlu0 %2580 }
 0x25f   :  { %v2585_v18 = vpop.permute.xlu0 %2584 }
 0x2f1   :  { %v3561_v13 = vpop.f32.mrf.mxu1 }
 0x2f2   :  { %v2764_v31 = vadd.f32 %v3561_v13, %v2626_v37  ;;  %v4872_v13 = vld [vmem:[#allocation17_spill] sm:$0xff] }
 0x2f3   :  { %v2758_v49 = vpop.f32.mrf.mxu1 }
 0x2f4   :  { %vm2839_vm1 = vcmp.gt.f32.partialorder %v2764_v31, 0.0  ;;  %v2856_v61 = vmul.f32 %v4657_v25, %v2764_v31  ;;  %v2759_v51 = vadd.f32 %v2758_v49, %v2625_v22 }
 0x2f6   :  { %v2872_v3 = vsel %vm2839_vm1, %v2764_v31, %v2856_v61  ;;  %vm2838_vm8 = vcmp.gt.f32.partialorder %v2759_v51, 0.0  ;;  %v2855_v53 = vmul.f32 %v4657_v25, %v2759_v51  ;;  %v3564_v28 = vpop.f32.mrf.mxu1  ;;  %v2618_v31 = vmax.f32 %v4872_v13, %v2581_v27 }
 0x2f7   :  { %2889 = vst.msk [vmem:[%s4774_s7 + $0x8] sm:$0xff] %vm2887_vm7, %v2872_v3  ;;  %v2774_v12 = vadd.f32 %v3564_v28, %v2628_v43  ;;  %v2636_v43 = vsel %vm2624_vm6, %v2619_v63, 0.0 }
 0x2f8   :  { %v2871_v47 = vsel %vm2838_vm8, %v2759_v51, %v2855_v53  ;;  %v2768_v29 = vpop.f32.mrf.mxu1  ;;  %v4873_v51 = vld [vmem:[#allocation18_spill] sm:$0xff]  ;;  %v2635_v11 = vsel %vm2624_vm6, %v2618_v31, 0.0 }
 0x2f9   :  { %2888 = vst.msk [vmem:[%s4774_s7] sm:$0xff] %vm2887_vm7, %v2871_v47  ;;  %vm2841_vm9 = vcmp.gt.f32.partialorder %v2774_v12, 0.0  ;;  %v2858_v5 = vmul.f32 %v4657_v25, %v2774_v12  ;;  %v2769_v52 = vadd.f32 %v2768_v29, %v2627_v15  ;;  %v2621_v55 = vmax.f32 %v4873_v51, %v2587_v42  ;;  %v2589_v47 = vpop.permute.xlu0 %2588 }
 0x2fa   :  { %v3567_v45 = vpop.f32.mrf.mxu1 }
 0x2fb   :  { %v2874_v0 = vsel %vm2841_vm9, %v2774_v12, %v2858_v5  ;;  %vm2840_vm10 = vcmp.gt.f32.partialorder %v2769_v52, 0.0  ;;  %v2857_v24 = vmul.f32 %v4657_v25, %v2769_v52  ;;  %v2784_v50 = vadd.f32 %v3567_v45, %v2630_v44 }
 0x2fc   :  { %2891 = vst.msk [vmem:[%s4774_s7 + $0x18] sm:$0xff] %vm2887_vm7, %v2874_v0  ;;  %v2778_v30 = vpop.f32.mrf.mxu1  ;;  %v2620_v12 = vmax.f32 %v4874_v17, %v2585_v18  ;;  %v2638_v58 = vsel %vm2624_vm6, %v2621_v55, 0.0 }
 0x2fd   :  { %v2873_v48 = vsel %vm2840_vm10, %v2769_v52, %v2857_v24  ;;  %vm2843_vm11 = vcmp.gt.f32.partialorder %v2784_v50, 0.0  ;;  %v2860_v23 = vmul.f32 %v4657_v25, %v2784_v50  ;;  %v2779_v54 = vadd.f32 %v2778_v30, %v2629_v38  ;;  %v4875_v52 = vld [vmem:[#allocation20_spill] sm:$0xff]  ;;  %v4876_v24 = vld [vmem:[#allocation21_spill] sm:$0xff] }
 0x2fe   :  { %2890 = vst.msk [vmem:[%s4774_s7 + $0x10] sm:$0xff] %vm2887_vm7, %v2873_v48  ;;  %v3570_v26 = vpop.f32.mrf.mxu1  ;;  %v2623_v46 = vmax.f32 %v4875_v52, %v2591_v21  ;;  %v2637_v39 = vsel %vm2624_vm6, %v2620_v12, 0.0 }
 0x2ff   :  { %v2876_v59 = vsel %vm2843_vm11, %v2784_v50, %v2860_v23  ;;  %vm2842_vm12 = vcmp.gt.f32.partialorder %v2779_v54, 0.0  ;;  %v2859_v2 = vmul.f32 %v4657_v25, %v2779_v54  ;;  %v2794_v62 = vadd.f32 %v3570_v26, %v2632_v40 }
 0x300   :  { %2893 = vst.msk [vmem:[%s4774_s7 + $0x28] sm:$0xff] %vm2887_vm7, %v2876_v59  ;;  %v2788_v33 = vpop.f32.mrf.mxu1  ;;  %v2622_v50 = vmax.f32 %v4876_v24, %v2589_v47  ;;  %v2640_v48 = vsel %vm2624_vm6, %v2623_v46, 0.0 }
 0x301   :  { %v2875_v36 = vsel %vm2842_vm12, %v2779_v54, %v2859_v2  ;;  %vm2845_vm13 = vcmp.gt.f32.partialorder %v2794_v62, 0.0  ;;  %v2862_v60 = vmul.f32 %v4657_v25, %v2794_v62  ;;  %v2789_v7 = vadd.f32 %v2788_v33, %v2631_v35 }
 0x302   :  { %2892 = vst.msk [vmem:[%s4774_s7 + $0x20] sm:$0xff] %vm2887_vm7, %v2875_v36  ;;  %v3573_v56 = vpop.f32.mrf.mxu1  ;;  %v2639_v40 = vsel %vm2624_vm6, %v2622_v50, 0.0 }
 0x303   :  { %v2878_v20 = vsel %vm2845_vm13, %v2794_v62, %v2862_v60  ;;  %vm2844_vm14 = vcmp.gt.f32.partialorder %v2789_v7, 0.0  ;;  %v2861_v9 = vmul.f32 %v4657_v25, %v2789_v7  ;;  %v2804_v37 = vadd.f32 %v3573_v56, %v2634_v32 }
 0x304   :  { %2895 = vst.msk [vmem:[%s4774_s7 + $0x38] sm:$0xff] %vm2887_vm7, %v2878_v20  ;;  %v2798_v34 = vpop.f32.mrf.mxu1 }
 0x305   :  { %v2877_v22 = vsel %vm2844_vm14, %v2789_v7, %v2861_v9  ;;  %vm2847_vm15 = vcmp.gt.f32.partialorder %v2804_v37, 0.0  ;;  %v2864_v49 = vmul.f32 %v4657_v25, %v2804_v37  ;;  %v2799_v61 = vadd.f32 %v2798_v34, %v2633_v14 }
 0x306   :  { %2894 = vst.msk [vmem:[%s4774_s7 + $0x30] sm:$0xff] %vm2887_vm7, %v2877_v22  ;;  %v3576_v8 = vpop.f32.mrf.mxu1 }
 0x307   :  { %v2880_v3 = vsel %vm2847_vm15, %v2804_v37, %v2864_v49  ;;  %vm2846_vm0 = vcmp.gt.f32.partialorder %v2799_v61, 0.0  ;;  %v2863_v53 = vmul.f32 %v4657_v25, %v2799_v61  ;;  %v2814_v28 = vadd.f32 %v3576_v8, %v2636_v43 }
 0x308   :  { %2897 = vst.msk [vmem:[%s4774_s7 + $0x48] sm:$0xff] %vm2887_vm7, %v2880_v3  ;;  %v2808_v1 = vpop.f32.mrf.mxu1 }
 0x309   :  { %v2879_v15 = vsel %vm2846_vm0, %v2799_v61, %v2863_v53  ;;  %vm2849_vm2 = vcmp.gt.f32.partialorder %v2814_v28, 0.0  ;;  %v2866_v29 = vmul.f32 %v4657_v25, %v2814_v28  ;;  %v2809_v5 = vadd.f32 %v2808_v1, %v2635_v11 }
 0x30a   :  { %2896 = vst.msk [vmem:[%s4774_s7 + $0x40] sm:$0xff] %vm2887_vm7, %v2879_v15  ;;  %v3579_v44 = vpop.f32.mrf.mxu1 }
 0x30b   :  { %v2882_v45 = vsel %vm2849_vm2, %v2814_v28, %v2866_v29  ;;  %vm2848_vm4 = vcmp.gt.f32.partialorder %v2809_v5, 0.0  ;;  %v2865_v19 = vmul.f32 %v4657_v25, %v2809_v5  ;;  %v2824_v0 = vadd.f32 %v3579_v44, %v2638_v58 }
 0x30c   :  { %2899 = vst.msk [vmem:[%s4774_s7 + $0x58] sm:$0xff] %vm2887_vm7, %v2882_v45  ;;  %v2818_v10 = vpop.f32.mrf.mxu1 }
 0x30d   :  { %v2881_v38 = vsel %vm2848_vm4, %v2809_v5, %v2865_v19  ;;  %vm2851_vm5 = vcmp.gt.f32.partialorder %v2824_v0, 0.0  ;;  %v2868_v30 = vmul.f32 %v4657_v25, %v2824_v0  ;;  %v2819_v27 = vadd.f32 %v2818_v10, %v2637_v39 }
 0x30e   :  { %2898 = vst.msk [vmem:[%s4774_s7 + $0x50] sm:$0xff] %vm2887_vm7, %v2881_v38  ;;  %v3582_v23 = vpop.f32.mrf.mxu1 }
 0x30f   :  { %v2884_v54 = vsel %vm2851_vm5, %v2824_v0, %v2868_v30  ;;  %vm2850_vm3 = vcmp.gt.f32.partialorder %v2819_v27, 0.0  ;;  %v2867_v41 = vmul.f32 %v4657_v25, %v2819_v27  ;;  %v2834_v57 = vadd.f32 %v3582_v23, %v2640_v48 }
 0x310   :  { %2901 = vst.msk [vmem:[%s4774_s7 + $0x68] sm:$0xff] %vm2887_vm7, %v2884_v54  ;;  %v2828_v26 = vpop.f32.mrf.mxu1 }
 0x311   :  { %v2883_v59 = vsel %vm2850_vm3, %v2819_v27, %v2867_v41  ;;  %vm2853_vm1 = vcmp.gt.f32.partialorder %v2834_v57, 0.0  ;;  %v2870_v2 = vmul.f32 %v4657_v25, %v2834_v57  ;;  %v2829_v62 = vadd.f32 %v2828_v26, %v2639_v40 }
 0x312   :  { %2900 = vst.msk [vmem:[%s4774_s7 + $0x60] sm:$0xff] %vm2887_vm7, %v2883_v59 }
 0x313   :  { %v2886_v16 = vsel %vm2853_vm1, %v2834_v57, %v2870_v2  ;;  %vm2852_vm8 = vcmp.gt.f32.partialorder %v2829_v62, 0.0  ;;  %v2869_v4 = vmul.f32 %v4657_v25, %v2829_v62 }
 0x314   :  { %2903 = vst.msk [vmem:[%s4774_s7 + $0x78] sm:$0xff] %vm2887_vm7, %v2886_v16 }
 0x315   :  { %v2885_v35 = vsel %vm2852_vm8, %v2829_v62, %v2869_v4 }
 0x316   :  { %2902 = vst.msk [vmem:[%s4774_s7 + $0x70] sm:$0xff] %vm2887_vm7, %v2885_v35 }
 0x317   :  { %2908 = vsyncpa [#allocation4], 1 }

</bundles_post_ra>
